<compile_context>
chip_gen: v5e
topology: v5e:2x2
jax: 0.10.0
libtpu: 0.0.40
codegen_flags: <defaults>
</compile_context>

<pallas_src>
import functools

import numpy as np
import jax
import jax.numpy as jnp
from jax import lax
from jax.experimental import pallas as pl
from jax.experimental.pallas import tpu as pltpu


_FUSED_DFT_MAX = 1024          # single (P, P) 2-D DFT matmul if H*W <= this
_MIB = 1024 * 1024


def _vmem_limit_bytes():
    """Per-generation VMEM budget: ~96 MiB on v5e/v6e (128 MiB physical),
    ~48 MiB on v7x (64 MiB physical), conservative 48 MiB when unknown."""
    cap = 64 * _MIB
    try:
        if jax.devices()[0].platform == "tpu":
            cap = int(pltpu.get_tpu_info().vmem_capacity_bytes)
    except Exception:            # CPU / interpret mode or older runtime
        pass
    return max(32 * _MIB, min(int(cap * 0.75), 100 * _MIB))


def _pick_tile(total, target, quantum):
    """Largest multiple of `quantum` that divides `total` and is <= target.
    Falls back to `total` (full-extent block, always layout-legal)."""
    best = None
    t = quantum
    while t <= min(total, target):
        if total % t == 0:
            best = t
        t += quantum
    return best if best is not None else total


def _frontend_fits(c, p, limit):
    bytes_needed = 4 * (2 * c * p * 2          # pred_S / pred_T blocks (dbuf)
                        + 2 * p * p * 2        # DFT matrices
                        + (c * c + c) * 2      # Wp / bp
                        + (4 * c * p + c) * 2  # outputs (dbuf)
                        + 8 * c * p)           # in-kernel temporaries headroom
    return p <= _FUSED_DFT_MAX and bytes_needed <= 0.8 * limit


def _fused_loss_fits(n, c, p, limit):
    bytes_needed = 4 * (5 * n * c * p * 2                  # FFTs + rand (dbuf)
                        + (2 * c * c + 4 * c + n * c) * 2  # weights/sim/sigma
                        + n * c * p                        # fusion scratch
                        + 8 * n * c * p)                   # temporaries headroom
    return bytes_needed <= 0.8 * limit


# ----------------------------------------------------------------------------
# Shared in-kernel math (traced inline into both loss kernels)
# ----------------------------------------------------------------------------
def _student_complex(s_mag, fsr, fsi, s_abs):
    """s_mag * e^{i*angle(fsr + i*fsi)}; torch.angle(0) == 0 -> (s_mag, 0)."""
    nz = s_abs > 0.0
    scale = s_mag / jnp.where(nz, s_abs, 1.0)
    return jnp.where(nz, scale * fsr, s_mag), jnp.where(nz, scale * fsi, 0.0)


def _riemann_bn_mse(ur, ui, vr, vi, sim):
    """sum over (N, Ct) of sim * sum_P (BN(Riem_k(stu)) - BN(Riem_k(tea)))^2."""

    def mean_np(x):                    # per-channel mean over batch + spatial
        return jnp.mean(jnp.mean(x, axis=2, keepdims=True),
                        axis=0, keepdims=True)

    def bnorm(x):                      # BatchNorm2d(affine=False), train stats
        m = mean_np(x)
        d = x - m
        v = mean_np(d * d)
        return d * lax.rsqrt(v + 1e-5)

    s_den = ur * ur + ui * ui + 1.0    # >= 1 -> reference clamp(1e-9) is no-op
    t_den = vr * vr + vi * vi + 1.0
    s_inv = 1.0 / s_den
    t_inv = 1.0 / t_den

    total = jnp.float32(0.0)
    for k in range(3):                 # stream components: one pair live at a time
        if k == 0:
            sa, ta = (2.0 * ur) * s_inv, (2.0 * vr) * t_inv
        elif k == 1:
            sa, ta = (2.0 * ui) * s_inv, (2.0 * vi) * t_inv
        else:
            sa, ta = (s_den - 2.0) * s_inv, (t_den - 2.0) * t_inv
        d = bnorm(sa) - bnorm(ta)
        e = jnp.sum(d * d, axis=2, keepdims=True)          # (N, Ct, 1)
        total = total + jnp.sum(e * sim)
    return total


# ----------------------------------------------------------------------------
# Fused front-end kernel: cosine sim + predictor conv + student/teacher DFT
# ----------------------------------------------------------------------------
def _frontend_kernel(s_ref, t_ref, wp_ref, bp_ref, d2r_ref, d2i_ref,
                     sim_ref, fsr_ref, fsi_ref, ftr_ref, fti_ref):
    s = s_ref[0]                                            # (C, P)
    t = t_ref[0]
    # 1 - cosine similarity over the flattened spatial dim, per channel.
    eps = 1e-8
    dot = jnp.sum(s * t, axis=1, keepdims=True)
    ns = jnp.maximum(jnp.sqrt(jnp.sum(s * s, axis=1, keepdims=True)), eps)
    nt = jnp.maximum(jnp.sqrt(jnp.sum(t * t, axis=1, keepdims=True)), eps)
    sim_ref[0] = 1.0 - dot / (ns * nt)
    # Predictor 1x1 conv (channel-major); `s2` never leaves VMEM.
    s2 = (jnp.dot(wp_ref[...], s, preferred_element_type=jnp.float32)
          + bp_ref[...])
    # Real-input ortho 2-D DFT; fftshift over (H, W) baked into d2r/d2i.
    d2r = d2r_ref[...]
    d2i = d2i_ref[...]
    fsr_ref[0] = jnp.dot(s2, d2r, preferred_element_type=jnp.float32)
    fsi_ref[0] = jnp.dot(s2, d2i, preferred_element_type=jnp.float32)
    ftr_ref[0] = jnp.dot(t, d2r, preferred_element_type=jnp.float32)
    fti_ref[0] = jnp.dot(t, d2i, preferred_element_type=jnp.float32)


def frontend_fused(s_ncp, t_ncp, wp, bp, d2r, d2i, limit):
    n, c, p = s_ncp.shape
    sample = pl.BlockSpec((1, c, p), lambda i: (i, 0, 0))
    return pl.pallas_call(
        _frontend_kernel,
        out_shape=(jax.ShapeDtypeStruct((n, c, 1), jnp.float32),
                   jax.ShapeDtypeStruct((n, c, p), jnp.float32),
                   jax.ShapeDtypeStruct((n, c, p), jnp.float32),
                   jax.ShapeDtypeStruct((n, c, p), jnp.float32),
                   jax.ShapeDtypeStruct((n, c, p), jnp.float32)),
        grid=(n,),
        in_specs=[sample, sample,
                  pl.BlockSpec((c, c), lambda i: (0, 0)),
                  pl.BlockSpec((c, 1), lambda i: (0, 0)),
                  pl.BlockSpec((p, p), lambda i: (0, 0)),
                  pl.BlockSpec((p, p), lambda i: (0, 0))],
        out_specs=(pl.BlockSpec((1, c, 1), lambda i: (i, 0, 0)),
                   sample, sample, sample, sample),
        compiler_params=pltpu.CompilerParams(
            dimension_semantics=("parallel",),
            vmem_limit_bytes=limit),
    )(s_ncp, t_ncp, wp, bp, d2r, d2i)


# ----------------------------------------------------------------------------
# Fully fused back-end kernel (|F|, n1/n2 convs, fusion, Riemann, BN, MSE)
# ----------------------------------------------------------------------------
def _fused_loss_kernel(fsr_ref, fsi_ref, ftr_ref, fti_ref, rnd_ref,
                       sim_ref, sigma_ref, w1_ref, b1_ref, w2_ref, b2_ref,
                       o_ref, fus_sc, *, inv_elems, loss_weight):
    fsr = fsr_ref[...]
    fsi = fsi_ref[...]
    ftr = ftr_ref[...]
    fti = fti_ref[...]
    s_abs = jnp.sqrt(fsr * fsr + fsi * fsi)
    t_abs = jnp.sqrt(ftr * ftr + fti * fti)
    alpha = jax.nn.sigmoid(sigma_ref[...])[0]               # (C, 1)
    w1 = w1_ref[...]
    b1 = b1_ref[...]
    w2 = w2_ref[...]
    b2 = b2_ref[...]
    for ni in range(fsr_ref.shape[0]):                      # static small batch
        n1 = jnp.dot(w1, s_abs[ni], preferred_element_type=jnp.float32) + b1
        n2 = jnp.dot(w2, t_abs[ni], preferred_element_type=jnp.float32) + b2
        fus_sc[ni] = alpha * n1 + (1.0 - alpha) * n2
    s_mag = fus_sc[...] * rnd_ref[...]                      # * torch.rand(...)
    ur, ui = _student_complex(s_mag, fsr, fsi, s_abs)
    # Teacher: abs * e^{i*angle} is the identity -> use (ftr, fti) directly.
    total = _riemann_bn_mse(ur, ui, ftr, fti, sim_ref[...])
    o_ref[...] = jnp.broadcast_to(total * (inv_elems * 0.5 * loss_weight),
                                  (1, 1))


def fused_loss(fsr, fsi, ftr, fti, rnd, sim, sigma, w1, b1, w2, b2, limit, *,
               loss_weight):
    n, c, p = fsr.shape
    kernel = functools.partial(_fused_loss_kernel,
                               inv_elems=1.0 / float(n * c * p),
                               loss_weight=float(loss_weight))
    big = pl.BlockSpec((n, c, p), lambda i: (0, 0, 0))
    out = pl.pallas_call(
        kernel,
        out_shape=jax.ShapeDtypeStruct((1, 1), jnp.float32),
        grid=(1,),
        in_specs=[big, big, big, big, big,
                  pl.BlockSpec((n, c, 1), lambda i: (0, 0, 0)),
                  pl.BlockSpec((1, c, 1), lambda i: (0, 0, 0)),
                  pl.BlockSpec((c, c), lambda i: (0, 0)),
                  pl.BlockSpec((c, 1), lambda i: (0, 0)),
                  pl.BlockSpec((c, c), lambda i: (0, 0)),
                  pl.BlockSpec((c, 1), lambda i: (0, 0))],
        out_specs=pl.BlockSpec((1, 1), lambda i: (0, 0)),
        scratch_shapes=[pltpu.VMEM((n, c, p), jnp.float32)],
        compiler_params=pltpu.CompilerParams(
            dimension_semantics=("arbitrary",),
            vmem_limit_bytes=limit),
    )(fsr, fsi, ftr, fti, rnd, sim, sigma, w1, b1, w2, b2)
    return out[0, 0]


# ----------------------------------------------------------------------------
# Fallback kernels (large shapes that exceed the fused-path VMEM budget)
# ----------------------------------------------------------------------------
def _cosine_dissim_kernel(s_ref, t_ref, o_ref):
    s = s_ref[...]
    t = t_ref[...]
    eps = 1e-8
    dot = jnp.sum(s * t, axis=1, keepdims=True)
    ns = jnp.maximum(jnp.sqrt(jnp.sum(s * s, axis=1, keepdims=True)), eps)
    nt = jnp.maximum(jnp.sqrt(jnp.sum(t * t, axis=1, keepdims=True)), eps)
    o_ref[...] = 1.0 - dot / (ns * nt)


def cosine_dissim(s2d, t2d, limit):
    r, p = s2d.shape
    per_row = 4.0 * p * (2 * 2 + 2)
    br = _pick_tile(r, min(1024, max(8, int(0.5 * limit / per_row))), 8)
    return pl.pallas_call(
        _cosine_dissim_kernel,
        out_shape=jax.ShapeDtypeStruct((r, 1), jnp.float32),
        grid=(r // br,),
        in_specs=[pl.BlockSpec((br, p), lambda i: (i, 0)),
                  pl.BlockSpec((br, p), lambda i: (i, 0))],
        out_specs=pl.BlockSpec((br, 1), lambda i: (i, 0)),
        compiler_params=pltpu.CompilerParams(
            dimension_semantics=("parallel",),
            vmem_limit_bytes=limit),
    )(s2d, t2d)


def _conv1x1_cm_kernel(x_ref, w_ref, b_ref, o_ref):
    o_ref[0] = (jnp.dot(w_ref[...], x_ref[0],
                        preferred_element_type=jnp.float32) + b_ref[...])


def _abs_conv1x1_cm_kernel(fr_ref, fi_ref, w_ref, b_ref, o_ref):
    fr = fr_ref[0]
    fi = fi_ref[0]
    a = jnp.sqrt(fr * fr + fi * fi)
    o_ref[0] = (jnp.dot(w_ref[...], a,
                        preferred_element_type=jnp.float32) + b_ref[...])


def _conv_tp(c, p, limit):
    per_col = 4.0 * c * (3 * 2 + 3)        # streamed blocks (dbuf) + temps
    target = max(128, int(0.5 * limit / per_col))
    return _pick_tile(p, min(target, 4096), 128)


def conv1x1_cm(x_ncp, w, b, limit):
    n, c, p = x_ncp.shape
    tp = _conv_tp(c, p, limit)
    return pl.pallas_call(
        _conv1x1_cm_kernel,
        out_shape=jax.ShapeDtypeStruct((n, c, p), jnp.float32),
        grid=(n, p // tp),
        in_specs=[pl.BlockSpec((1, c, tp), lambda i, j: (i, 0, j)),
                  pl.BlockSpec((c, c), lambda i, j: (0, 0)),
                  pl.BlockSpec((c, 1), lambda i, j: (0, 0))],
        out_specs=pl.BlockSpec((1, c, tp), lambda i, j: (i, 0, j)),
        compiler_params=pltpu.CompilerParams(
            dimension_semantics=("parallel", "parallel"),
            vmem_limit_bytes=limit),
    )(x_ncp, w, b)


def abs_conv1x1_cm(fr, fi, w, b, limit):
    n, c, p = fr.shape
    tp = _conv_tp(c, p, limit)
    return pl.pallas_call(
        _abs_conv1x1_cm_kernel,
        out_shape=jax.ShapeDtypeStruct((n, c, p), jnp.float32),
        grid=(n, p // tp),
        in_specs=[pl.BlockSpec((1, c, tp), lambda i, j: (i, 0, j)),
                  pl.BlockSpec((1, c, tp), lambda i, j: (i, 0, j)),
                  pl.BlockSpec((c, c), lambda i, j: (0, 0)),
                  pl.BlockSpec((c, 1), lambda i, j: (0, 0))],
        out_specs=pl.BlockSpec((1, c, tp), lambda i, j: (i, 0, j)),
        compiler_params=pltpu.CompilerParams(
            dimension_semantics=("parallel", "parallel"),
            vmem_limit_bytes=limit),
    )(fr, fi, w, b)


def _rdft2_separable_kernel(x_ref, dwr_ref, dwi_ref, dhr_ref, dhi_ref,
                            or_ref, oi_ref):
    bnc, h, w = x_ref.shape
    x2 = x_ref[...].reshape(bnc * h, w)
    # Batched W-stage: a single pair of MXU dots for the whole slab block.
    yr = jnp.dot(x2, dwr_ref[...],
                 preferred_element_type=jnp.float32).reshape(bnc, h, w)
    yi = jnp.dot(x2, dwi_ref[...],
                 preferred_element_type=jnp.float32).reshape(bnc, h, w)
    dhr = dhr_ref[...]
    dhi = dhi_ref[...]
    dhs = dhr + dhi
    for bi in range(bnc):                  # H-stage: Gauss 3-multiply per slab
        p1 = jnp.dot(dhr, yr[bi], preferred_element_type=jnp.float32)
        p2 = jnp.dot(dhi, yi[bi], preferred_element_type=jnp.float32)
        p3 = jnp.dot(dhs, yr[bi] + yi[bi], preferred_element_type=jnp.float32)
        or_ref[bi] = p1 - p2
        oi_ref[bi] = p3 - p1 - p2


def rdft2_separable(x_nchw, dwr, dwi, dhr, dhi, limit):
    n, c, h, w = x_nchw.shape
    r = n * c
    per_slab = 4.0 * h * w * (3 * 2 + 6)
    bnc = _pick_tile(r, min(64, max(1, int(0.5 * limit / per_slab))), 1)
    x3 = x_nchw.reshape(r, h, w)
    fr, fi = pl.pallas_call(
        _rdft2_separable_kernel,
        out_shape=(jax.ShapeDtypeStruct((r, h, w), jnp.float32),
                   jax.ShapeDtypeStruct((r, h, w), jnp.float32)),
        grid=(r // bnc,),
        in_specs=[pl.BlockSpec((bnc, h, w), lambda i: (i, 0, 0)),
                  pl.BlockSpec((w, w), lambda i: (0, 0)),
                  pl.BlockSpec((w, w), lambda i: (0, 0)),
                  pl.BlockSpec((h, h), lambda i: (0, 0)),
                  pl.BlockSpec((h, h), lambda i: (0, 0))],
        out_specs=(pl.BlockSpec((bnc, h, w), lambda i: (i, 0, 0)),
                   pl.BlockSpec((bnc, h, w), lambda i: (i, 0, 0))),
        compiler_params=pltpu.CompilerParams(
            dimension_semantics=("parallel",),
            vmem_limit_bytes=limit),
    )(x3, dwr, dwi, dhr, dhi)
    return fr.reshape(n, c, h * w), fi.reshape(n, c, h * w)


def _tiled_loss_kernel(fsr_ref, fsi_ref, ftr_ref, fti_ref, rnd_ref,
                       n1_ref, n2_ref, sim_ref, sigma_ref, o_ref,
                       *, inv_elems, loss_weight):
    fsr = fsr_ref[...]
    fsi = fsi_ref[...]
    ftr = ftr_ref[...]
    fti = fti_ref[...]
    alpha = jax.nn.sigmoid(sigma_ref[...])                  # (1, tc, 1)
    fusion = alpha * n1_ref[...] + (1.0 - alpha) * n2_ref[...]
    s_mag = fusion * rnd_ref[...]
    s_abs = jnp.sqrt(fsr * fsr + fsi * fsi)
    ur, ui = _student_complex(s_mag, fsr, fsi, s_abs)
    total = _riemann_bn_mse(ur, ui, ftr, fti, sim_ref[...])
    # Lane-dense per-tile partial sum (reduced outside); every grid step writes
    # its own block so the axis is "parallel" (both v7x TensorCores usable).
    o_ref[...] = jnp.broadcast_to(total * (inv_elems * 0.5 * loss_weight),
                                  (8, 128))


def tiled_loss(fsr, fsi, ftr, fti, rnd, n1, n2, sim, sigma, limit, *,
               loss_weight):
    n, c, p = fsr.shape
    per_chan = 4.0 * n * p * (7 * 2 + 8)    # 7 streamed tensors (dbuf) + temps
    tc = _pick_tile(c, min(512, max(8, int(0.7 * limit / per_chan))), 8)
    ntiles = c // tc
    kernel = functools.partial(_tiled_loss_kernel,
                               inv_elems=1.0 / float(n * c * p),
                               loss_weight=float(loss_weight))
    big = pl.BlockSpec((n, tc, p), lambda i: (0, i, 0))
    out = pl.pallas_call(
        kernel,
        out_shape=jax.ShapeDtypeStruct((ntiles * 8, 128), jnp.float32),
        grid=(ntiles,),
        in_specs=[big, big, big, big, big, big, big,
                  pl.BlockSpec((n, tc, 1), lambda i: (0, i, 0)),
                  pl.BlockSpec((1, tc, 1), lambda i: (0, i, 0))],
        out_specs=pl.BlockSpec((8, 128), lambda i: (i, 0)),
        compiler_params=pltpu.CompilerParams(
            dimension_semantics=("parallel",),
            vmem_limit_bytes=limit),
    )(fsr, fsi, ftr, fti, rnd, n1, n2, sim, sigma)
    return jnp.sum(out[::8, 0])


# ----------------------------------------------------------------------------
# DFT matrices (fftshift over H/W baked in) and the full forward pass
# ----------------------------------------------------------------------------
def _dft_1d(n):
    k = np.arange(n)
    return np.exp(-2j * np.pi * np.outer(k, k) / n) / np.sqrt(n)


def _dft2_matrices_fused(h, w):
    # (H*W, H*W) ortho 2-D DFT matrix applied on the right; fftshift over
    # (H, W) baked in by rolling the output-frequency columns.
    dh = np.roll(_dft_1d(h), h // 2, axis=1)
    dw = np.roll(_dft_1d(w), w // 2, axis=1)
    d2 = np.kron(dh, dw)
    return (jnp.asarray(d2.real, jnp.float32),
            jnp.asarray(d2.imag, jnp.float32))


def _dft2_matrices_separable(h, w):
    dw = np.roll(_dft_1d(w), w // 2, axis=1)   # right-multiplied: roll out cols
    dh = np.roll(_dft_1d(h), h // 2, axis=0)   # left-multiplied:  roll out rows
    return (jnp.asarray(dw.real, jnp.float32),
            jnp.asarray(dw.imag, jnp.float32),
            jnp.asarray(dh.real, jnp.float32),
            jnp.asarray(dh.imag, jnp.float32))


def fourier_loss(pred_S, pred_T, params, rng_key, loss_weight=1.0):
    # TODO(synk): F.interpolate bilinear resize branch not implemented.
    assert pred_S.shape == pred_T.shape, "equal spatial sizes assumed"
    n, c, h, w = pred_S.shape
    p = h * w
    sn, sc = n // 2, c // 2
    limit = _vmem_limit_bytes()

    s_ncp = pred_S.reshape(n, c, p).astype(jnp.float32)
    t_ncp = pred_T.reshape(n, c, p).astype(jnp.float32)

    # Fold the N/C part of fftshift (the reference shifts ALL four dims) into
    # the tiny per-channel metadata; the loss is invariant under this
    # consistent relabeling, so no full-tensor roll passes are needed.
    w1_f = jnp.roll(params["W1"], (-sc, -sc), axis=(0, 1))
    b1_f = jnp.roll(params["b1"], -sc).reshape(c, 1)
    w2_f = jnp.roll(params["W2"], (-sc, -sc), axis=(0, 1))
    b2_f = jnp.roll(params["b2"], -sc).reshape(c, 1)
    sigma_f = jnp.roll(params["sigma"], -sc).reshape(1, c, 1)
    wp = params["Wp"]
    bp = params["bp"].reshape(c, 1)

    if _frontend_fits(c, p, limit):
        # One pass over pred_S / pred_T: cosine sim + predictor conv + DFTs.
        d2r, d2i = _dft2_matrices_fused(h, w)
        sim, fsr, fsi, ftr, fti = frontend_fused(
            s_ncp, t_ncp, wp, bp, d2r, d2i, limit)
    else:
        sim = cosine_dissim(s_ncp.reshape(n * c, p), t_ncp.reshape(n * c, p),
                            limit).reshape(n, c, 1)
        s2 = conv1x1_cm(s_ncp, wp, bp, limit)
        mats = _dft2_matrices_separable(h, w)
        fsr, fsi = rdft2_separable(s2.reshape(n, c, h, w), *mats, limit)
        ftr, fti = rdft2_separable(t_ncp.reshape(n, c, h, w), *mats, limit)

    sim_f = jnp.roll(sim, (-sn, -sc), axis=(0, 1))
    # torch.rand multiplier (different RNG stream than PyTorch; iid uniform so
    # the N/C relabeling needs no roll here).
    rnd = jax.random.uniform(rng_key, (n, c, p), jnp.float32)

    if _fused_loss_fits(n, c, p, limit):
        return fused_loss(fsr, fsi, ftr, fti, rnd, sim_f, sigma_f,
                          w1_f, b1_f, w2_f, b2_f, limit,
                          loss_weight=loss_weight)
    n1 = abs_conv1x1_cm(fsr, fsi, w1_f, b1_f, limit)
    n2 = abs_conv1x1_cm(ftr, fti, w2_f, b2_f, limit)
    return tiled_loss(fsr, fsi, ftr, fti, rnd, n1, n2, sim_f, sigma_f, limit,
                      loss_weight=loss_weight)


def init_params(key, c):
    # Deterministic synthetic init mimicking Conv2d kaiming-uniform bounds.
    ks = jax.random.split(key, 6)
    bound = 1.0 / np.sqrt(c)

    def u(k, shape):
        return jax.random.uniform(k, shape, jnp.float32, -bound, bound)

    return dict(
        Wp=u(ks[0], (c, c)), bp=u(ks[1], (c,)),      # predictor
        W1=u(ks[2], (c, c)), b1=u(ks[3], (c,)),      # atfm.conv1x1
        W2=u(ks[4], (c, c)), b2=u(ks[5], (c,)),      # atfm.conv1x1_b
        sigma=jnp.zeros((c,), jnp.float32),          # atfm.sigma_tensor
    )


if __name__ == "__main__":
    key = jax.random.PRNGKey(0)
    k1, k2, k3, k4 = jax.random.split(key, 4)
    N, C, H, W = 2, 4, 16, 16
    pred_S = jax.random.normal(k1, (N, C, H, W), jnp.float32)
    pred_T = jax.random.normal(k2, (N, C, H, W), jnp.float32)
    params = init_params(k3, C)

    loss = fourier_loss(pred_S, pred_T, params, k4, loss_weight=1.0)
    loss = jax.block_until_ready(loss)
    assert bool(jnp.isfinite(loss))
    print("KERNEL_OK")
</pallas_src>

<mosaic_0001>
module attributes {stable_mosaic.version = 11 : i64} {
  func.func @_frontend_kernel(%arg0: i32, %arg1: memref<1x4x256xf32, #tpu.memory_space<vmem>>, %arg2: memref<1x4x256xf32, #tpu.memory_space<vmem>>, %arg3: memref<4x4xf32, #tpu.memory_space<vmem>>, %arg4: memref<4x1xf32, #tpu.memory_space<vmem>>, %arg5: memref<256x256xf32, #tpu.memory_space<vmem>>, %arg6: memref<256x256xf32, #tpu.memory_space<vmem>>, %arg7: memref<1x4x1xf32, #tpu.memory_space<vmem>>, %arg8: memref<1x4x256xf32, #tpu.memory_space<vmem>>, %arg9: memref<1x4x256xf32, #tpu.memory_space<vmem>>, %arg10: memref<1x4x256xf32, #tpu.memory_space<vmem>>, %arg11: memref<1x4x256xf32, #tpu.memory_space<vmem>>) attributes {dimension_semantics = [#tpu.dimension_semantics<parallel>], iteration_bounds = array<i64: 2>, scalar_prefetch = 0 : i64, scratch_operands = 0 : i64, tpu.core_type = #tpu.core_type<tc>, window_params = [{transform_indices = @transform_0, window_bounds = array<i64: 1, 4, 256>}, {transform_indices = @transform_1, window_bounds = array<i64: 1, 4, 256>}, {pipeline_mode = #tpu.pipeline_mode<synchronous>, transform_indices = @transform_2, window_bounds = array<i64: 4, 4>}, {pipeline_mode = #tpu.pipeline_mode<synchronous>, transform_indices = @transform_3, window_bounds = array<i64: 4, 1>}, {pipeline_mode = #tpu.pipeline_mode<synchronous>, transform_indices = @transform_4, window_bounds = array<i64: 256, 256>}, {pipeline_mode = #tpu.pipeline_mode<synchronous>, transform_indices = @transform_5, window_bounds = array<i64: 256, 256>}, {transform_indices = @transform_6, window_bounds = array<i64: 1, 4, 1>}, {transform_indices = @transform_7, window_bounds = array<i64: 1, 4, 256>}, {transform_indices = @transform_8, window_bounds = array<i64: 1, 4, 256>}, {transform_indices = @transform_9, window_bounds = array<i64: 1, 4, 256>}, {transform_indices = @transform_10, window_bounds = array<i64: 1, 4, 256>}]} {
    %c0 = arith.constant 0 : index
    %c0_0 = arith.constant 0 : index
    %c0_1 = arith.constant 0 : index
    %0 = vector.load %arg1[%c0, %c0_0, %c0_1] : memref<1x4x256xf32, #tpu.memory_space<vmem>>, vector<1x4x256xf32>
    %1 = vector.shape_cast %0 : vector<1x4x256xf32> to vector<4x256xf32>
    %c0_2 = arith.constant 0 : index
    %c0_3 = arith.constant 0 : index
    %c0_4 = arith.constant 0 : index
    %2 = vector.load %arg2[%c0_2, %c0_3, %c0_4] : memref<1x4x256xf32, #tpu.memory_space<vmem>>, vector<1x4x256xf32>
    %3 = vector.shape_cast %2 : vector<1x4x256xf32> to vector<4x256xf32>
    %4 = arith.mulf %1, %3 : vector<4x256xf32>
    %cst = arith.constant dense<0.000000e+00> : vector<4xf32>
    %5 = vector.multi_reduction <add>, %4, %cst [1] : vector<4x256xf32> to vector<4xf32>
    %6 = vector.shape_cast %5 : vector<4xf32> to vector<4x1xf32>
    %7 = arith.mulf %1, %1 : vector<4x256xf32>
    %cst_5 = arith.constant dense<0.000000e+00> : vector<4xf32>
    %8 = vector.multi_reduction <add>, %7, %cst_5 [1] : vector<4x256xf32> to vector<4xf32>
    %9 = vector.shape_cast %8 : vector<4xf32> to vector<4x1xf32>
    %10 = math.sqrt %9 : vector<4x1xf32>
    %cst_6 = arith.constant 9.99999993E-9 : f32
    %11 = vector.broadcast %cst_6 : f32 to vector<4x1xf32>
    %12 = arith.maximumf %10, %11 : vector<4x1xf32>
    %13 = arith.mulf %3, %3 : vector<4x256xf32>
    %cst_7 = arith.constant dense<0.000000e+00> : vector<4xf32>
    %14 = vector.multi_reduction <add>, %13, %cst_7 [1] : vector<4x256xf32> to vector<4xf32>
    %15 = vector.shape_cast %14 : vector<4xf32> to vector<4x1xf32>
    %16 = math.sqrt %15 : vector<4x1xf32>
    %cst_8 = arith.constant 9.99999993E-9 : f32
    %17 = vector.broadcast %cst_8 : f32 to vector<4x1xf32>
    %18 = arith.maximumf %16, %17 : vector<4x1xf32>
    %19 = arith.mulf %12, %18 : vector<4x1xf32>
    %20 = arith.divf %6, %19 : vector<4x1xf32>
    %cst_9 = arith.constant 1.000000e+00 : f32
    %21 = vector.broadcast %cst_9 : f32 to vector<4x1xf32>
    %22 = arith.subf %21, %20 : vector<4x1xf32>
    %c0_10 = arith.constant 0 : index
    %c0_11 = arith.constant 0 : index
    %c0_12 = arith.constant 0 : index
    %23 = vector.load %arg7[%c0_10, %c0_11, %c0_12] : memref<1x4x1xf32, #tpu.memory_space<vmem>>, vector<1x4x1xf32>
    %24 = vector.shape_cast %23 : vector<1x4x1xf32> to vector<4x1xf32>
    %25 = vector.shape_cast %22 : vector<4x1xf32> to vector<1x4x1xf32>
    tpu.vector_store %arg7[%c0_10, %c0_11, %c0_12], %25 {strides = array<i32>} : memref<1x4x1xf32, #tpu.memory_space<vmem>>, vector<1x4x1xf32>,
    %c0_13 = arith.constant 0 : index
    %c0_14 = arith.constant 0 : index
    %26 = vector.load %arg3[%c0_13, %c0_14] : memref<4x4xf32, #tpu.memory_space<vmem>>, vector<4x4xf32>
    %cst_15 = arith.constant dense<0.000000e+00> : vector<4x256xf32>
    %27 = tpu.matmul %26, %1, %cst_15 {dimension_numbers = #tpu.dot_dimension_numbers<[1], [0], [0], [1], [0, 0, 1, 1], [], []>} : vector<4x4xf32>, vector<4x256xf32>, vector<4x256xf32> -> vector<4x256xf32>
    %c0_16 = arith.constant 0 : index
    %c0_17 = arith.constant 0 : index
    %28 = vector.load %arg4[%c0_16, %c0_17] : memref<4x1xf32, #tpu.memory_space<vmem>>, vector<4x1xf32>
    %29 = vector.broadcast %28 : vector<4x1xf32> to vector<4x256xf32>
    %30 = arith.addf %27, %29 : vector<4x256xf32>
    %c0_18 = arith.constant 0 : index
    %c0_19 = arith.constant 0 : index
    %31 = vector.load %arg5[%c0_18, %c0_19] : memref<256x256xf32, #tpu.memory_space<vmem>>, vector<256x256xf32>
    %c0_20 = arith.constant 0 : index
    %c0_21 = arith.constant 0 : index
    %32 = vector.load %arg6[%c0_20, %c0_21] : memref<256x256xf32, #tpu.memory_space<vmem>>, vector<256x256xf32>
    %cst_22 = arith.constant dense<0.000000e+00> : vector<4x256xf32>
    %33 = tpu.matmul %30, %31, %cst_22 {dimension_numbers = #tpu.dot_dimension_numbers<[1], [0], [0], [1], [0, 0, 1, 1], [], []>} : vector<4x256xf32>, vector<256x256xf32>, vector<4x256xf32> -> vector<4x256xf32>
    %c0_23 = arith.constant 0 : index
    %c0_24 = arith.constant 0 : index
    %c0_25 = arith.constant 0 : index
    %34 = vector.load %arg8[%c0_23, %c0_24, %c0_25] : memref<1x4x256xf32, #tpu.memory_space<vmem>>, vector<1x4x256xf32>
    %35 = vector.shape_cast %34 : vector<1x4x256xf32> to vector<4x256xf32>
    %36 = vector.shape_cast %33 : vector<4x256xf32> to vector<1x4x256xf32>
    tpu.vector_store %arg8[%c0_23, %c0_24, %c0_25], %36 {strides = array<i32>} : memref<1x4x256xf32, #tpu.memory_space<vmem>>, vector<1x4x256xf32>,
    %cst_26 = arith.constant dense<0.000000e+00> : vector<4x256xf32>
    %37 = tpu.matmul %30, %32, %cst_26 {dimension_numbers = #tpu.dot_dimension_numbers<[1], [0], [0], [1], [0, 0, 1, 1], [], []>} : vector<4x256xf32>, vector<256x256xf32>, vector<4x256xf32> -> vector<4x256xf32>
    %c0_27 = arith.constant 0 : index
    %c0_28 = arith.constant 0 : index
    %c0_29 = arith.constant 0 : index
    %38 = vector.load %arg9[%c0_27, %c0_28, %c0_29] : memref<1x4x256xf32, #tpu.memory_space<vmem>>, vector<1x4x256xf32>
    %39 = vector.shape_cast %38 : vector<1x4x256xf32> to vector<4x256xf32>
    %40 = vector.shape_cast %37 : vector<4x256xf32> to vector<1x4x256xf32>
    tpu.vector_store %arg9[%c0_27, %c0_28, %c0_29], %40 {strides = array<i32>} : memref<1x4x256xf32, #tpu.memory_space<vmem>>, vector<1x4x256xf32>,
    %cst_30 = arith.constant dense<0.000000e+00> : vector<4x256xf32>
    %41 = tpu.matmul %3, %31, %cst_30 {dimension_numbers = #tpu.dot_dimension_numbers<[1], [0], [0], [1], [0, 0, 1, 1], [], []>} : vector<4x256xf32>, vector<256x256xf32>, vector<4x256xf32> -> vector<4x256xf32>
    %c0_31 = arith.constant 0 : index
    %c0_32 = arith.constant 0 : index
    %c0_33 = arith.constant 0 : index
    %42 = vector.load %arg10[%c0_31, %c0_32, %c0_33] : memref<1x4x256xf32, #tpu.memory_space<vmem>>, vector<1x4x256xf32>
    %43 = vector.shape_cast %42 : vector<1x4x256xf32> to vector<4x256xf32>
    %44 = vector.shape_cast %41 : vector<4x256xf32> to vector<1x4x256xf32>
    tpu.vector_store %arg10[%c0_31, %c0_32, %c0_33], %44 {strides = array<i32>} : memref<1x4x256xf32, #tpu.memory_space<vmem>>, vector<1x4x256xf32>,
    %cst_34 = arith.constant dense<0.000000e+00> : vector<4x256xf32>
    %45 = tpu.matmul %3, %32, %cst_34 {dimension_numbers = #tpu.dot_dimension_numbers<[1], [0], [0], [1], [0, 0, 1, 1], [], []>} : vector<4x256xf32>, vector<256x256xf32>, vector<4x256xf32> -> vector<4x256xf32>
    %c0_35 = arith.constant 0 : index
    %c0_36 = arith.constant 0 : index
    %c0_37 = arith.constant 0 : index
    %46 = vector.load %arg11[%c0_35, %c0_36, %c0_37] : memref<1x4x256xf32, #tpu.memory_space<vmem>>, vector<1x4x256xf32>
    %47 = vector.shape_cast %46 : vector<1x4x256xf32> to vector<4x256xf32>
    %48 = vector.shape_cast %45 : vector<4x256xf32> to vector<1x4x256xf32>
    tpu.vector_store %arg11[%c0_35, %c0_36, %c0_37], %48 {strides = array<i32>} : memref<1x4x256xf32, #tpu.memory_space<vmem>>, vector<1x4x256xf32>,
    return
  }
  func.func @transform_0(%arg0: i32) -> (i32, i32, i32) {
    %c0_i32 = arith.constant 0 : i32
    %c0_i32_0 = arith.constant 0 : i32
    %c0_i32_1 = arith.constant 0 : i32
    return %arg0, %c0_i32, %c0_i32_0 : i32, i32, i32
  }
  func.func @transform_1(%arg0: i32) -> (i32, i32, i32) {
    %c0_i32 = arith.constant 0 : i32
    %c0_i32_0 = arith.constant 0 : i32
    %c0_i32_1 = arith.constant 0 : i32
    return %arg0, %c0_i32, %c0_i32_0 : i32, i32, i32
  }
  func.func @transform_2(%arg0: i32) -> (i32, i32) {
    %c0_i32 = arith.constant 0 : i32
    %c0_i32_0 = arith.constant 0 : i32
    %c0_i32_1 = arith.constant 0 : i32
    return %c0_i32, %c0_i32_0 : i32, i32
  }
  func.func @transform_3(%arg0: i32) -> (i32, i32) {
    %c0_i32 = arith.constant 0 : i32
    %c0_i32_0 = arith.constant 0 : i32
    %c0_i32_1 = arith.constant 0 : i32
    return %c0_i32, %c0_i32_0 : i32, i32
  }
  func.func @transform_4(%arg0: i32) -> (i32, i32) {
    %c0_i32 = arith.constant 0 : i32
    %c0_i32_0 = arith.constant 0 : i32
    %c0_i32_1 = arith.constant 0 : i32
    return %c0_i32, %c0_i32_0 : i32, i32
  }
  func.func @transform_5(%arg0: i32) -> (i32, i32) {
    %c0_i32 = arith.constant 0 : i32
    %c0_i32_0 = arith.constant 0 : i32
    %c0_i32_1 = arith.constant 0 : i32
    return %c0_i32, %c0_i32_0 : i32, i32
  }
  func.func @transform_6(%arg0: i32) -> (i32, i32, i32) {
    %c0_i32 = arith.constant 0 : i32
    %c0_i32_0 = arith.constant 0 : i32
    %c0_i32_1 = arith.constant 0 : i32
    return %arg0, %c0_i32, %c0_i32_0 : i32, i32, i32
  }
  func.func @transform_7(%arg0: i32) -> (i32, i32, i32) {
    %c0_i32 = arith.constant 0 : i32
    %c0_i32_0 = arith.constant 0 : i32
    %c0_i32_1 = arith.constant 0 : i32
    return %arg0, %c0_i32, %c0_i32_0 : i32, i32, i32
  }
  func.func @transform_8(%arg0: i32) -> (i32, i32, i32) {
    %c0_i32 = arith.constant 0 : i32
    %c0_i32_0 = arith.constant 0 : i32
    %c0_i32_1 = arith.constant 0 : i32
    return %arg0, %c0_i32, %c0_i32_0 : i32, i32, i32
  }
  func.func @transform_9(%arg0: i32) -> (i32, i32, i32) {
    %c0_i32 = arith.constant 0 : i32
    %c0_i32_0 = arith.constant 0 : i32
    %c0_i32_1 = arith.constant 0 : i32
    return %arg0, %c0_i32, %c0_i32_0 : i32, i32, i32
  }
  func.func @transform_10(%arg0: i32) -> (i32, i32, i32) {
    %c0_i32 = arith.constant 0 : i32
    %c0_i32_0 = arith.constant 0 : i32
    %c0_i32_1 = arith.constant 0 : i32
    return %arg0, %c0_i32, %c0_i32_0 : i32, i32, i32
  }
}

</mosaic_0001>

<bundles_post_ra>
// kernel: tpu_custom_call.1
= control target key start
LH: loop header
LB: loop body
LE: loop exit
PB: predicated region body
PF: predicated region fallthrough
CT: control target
= control target key end

     0   :  { %s2754_s0 = inlined_call_operand.hbm [shape: f32[2,4,256], index: 0, kind: input, shape index: {}]   ;;  %s2755_s1 = inlined_call_operand.hbm [shape: f32[2,4,256], index: 1, kind: input, shape index: {}]   ;;  %s2756_s2 = inlined_call_operand.vmem [shape: f32[4,4], index: 2, kind: input, shape index: {}]   ;;  %s2757_s3 = inlined_call_operand.vmem [shape: f32[4,1], index: 3, kind: input, shape index: {}]   ;;  %s2758_s4 = inlined_call_operand.hbm [shape: f32[256,256], index: 4, kind: input, shape index: {}]   ;;  %s2759_s5 = inlined_call_operand.hbm [shape: f32[256,256], index: 5, kind: input, shape index: {}]   ;;  %s2760_s6 = inlined_call_operand.vmem [shape: f32[2,4,1], index: 6, kind: output, shape index: {0}]   ;;  %s2761_s7 = inlined_call_operand.hbm [shape: f32[2,4,256], index: 7, kind: output, shape index: {1}]   ;;  %s2762_s8 = inlined_call_operand.hbm [shape: f32[2,4,256], index: 8, kind: output, shape index: {2}]   ;;  %s2763_s9 = inlined_call_operand.hbm [shape: f32[2,4,256], index: 9, kind: output, shape index: {3}]   ;;  %s2764_s10 = inlined_call_operand.hbm [shape: f32[2,4,256], index: 10, kind: output, shape index: {4}]  }
   0x1   :  { %2851 = sst [smem:[#allocation108_spill]] %s2758_s4 }
   0x2   :  { %2852 = sst [smem:[#allocation109_spill]] %s2759_s5 }
   0x3   :  { %2853 = sst [smem:[#allocation110_spill]] %s2764_s10 }
   0x4   :  { %16 = vsyncpa [#allocation3], 0 }
   0x5   :  { %18 = vsyncpa [#allocation3 + $0x1], 0 }
   0x6   :  { %19 = vsyncpa [#allocation6], 0 }
   0x7   :  { %21 = vsyncpa [#allocation6 + $0x1], 0 }
   0x8   :  { %22 = vsyncpa [#allocation9], 0 }
   0x9   :  { %23 = vsyncpa [#allocation4], 0 }
   0xa   :  { %25 = vsyncpa [#allocation4 + $0x1], 0 }
   0xb   :  { %26 = vsyncpa [#allocation12], 0 }
   0xc   :  { %28 = vsyncpa [#allocation12 + $0x1], 0 }
   0xd   :  { %29 = vsyncpa [#allocation15], 0 }
   0xe   :  { %31 = vsyncpa [#allocation15 + $0x1], 0  ;;  %s1925_s13 = smov 0   ;;  %s1927_s14 = smov 0  }
   0xf   :  { %s1929_s15 = smov 0   ;;  %s1931_s16 = smov 0  }
  0x10 LB: > { %2854 = sst [smem:[#allocation23_spill]] %s1851_s13  ;;  %s1949_s20 = sadd.s32 4294967295, %s1863_s16   ;;  %s1863_s16 = sphi %s1931_s16, %s3032_s16   ;;  %s1859_s15 = sphi %s1929_s15, %s3034_s15   ;;  %s1855_s14 = sphi %s1927_s14, %s3036_s14   ;;  %s1851_s13 = sphi %s1925_s13, %s3035_s13  }
  0x11   : > { %2855 = sst [smem:[#allocation24_spill]] %s1859_s15  ;;  %p1432_p0 = scmp.ge.s32.totalorder %s1863_s16, 1 }
  0x12   : > { %2856 = sst [smem:[#allocation25_spill]] %s1863_s16  ;;  %p58_p1 = scmp.eq.s32.totalorder %s1949_s20, 0 }
  0x13   : > { %s2857_s4 = sld [smem:[#allocation108_spill]]  ;;  %p308_p2 = scmp.lt.s32.totalorder %s1863_s16, 3 }
  0x14   : > { %s1865_s22 = smov [#allocation7]   ;;  %s2859_s5 = sld [smem:[#allocation109_spill]] }
  0x15   : > { %p1954_p3 = pnand %p1432_p0, %p308_p2  ;;  %s327_s23 = sshll.u32 %s1865_s22, 4  ;;  %s328_s23 = int_to_ptr.vmem [resolvable:$true] %s327_s23 }
  0x16   : > { %s1866_s27 = smov [#allocation8]   ;;  %s1867_s29 = smov 256  }
  0x17   : > { %p1496_p4 = pneg %p1954_p3  ;;  %s341_s28 = sshll.u32 %s1866_s27, 4  ;;  %s342_s28 = int_to_ptr.vmem [resolvable:$true] %s341_s28 }
  0x18   : > { %s1868_s30 = smov 16   ;;  %s2765_s11 = sadd.s32 4294967294, %s1863_s16  }
  0x19   : > { %s325_s19 = sshll.u32 %s2857_s4, 4  ;;  %p1497_p6 = pnand %p1496_p4, %p58_p1  ;;  %s326_s19 = int_to_ptr.hbm [resolvable:$true] %s325_s19 }
  0x1a   : > { %s339_s26 = sshll.u32 %s2859_s5, 4  ;;  %s1968_s12 = sadd.s32 1, %s1863_s16   ;;  %s340_s26 = int_to_ptr.hbm [resolvable:$true] %s339_s26 }
  0x1b   : > { %1499 = dma.hbm_to_vmem [thread:$0]  (!%p1497_p6), %s326_s19, 8192, %s328_s23, [#allocation6], %s1867_s29, %s1867_s29, %s1868_s30  }
  0x1c   : > { %1502 = dma.hbm_to_vmem [thread:$0]  (!%p1497_p6), %s340_s26, 8192, %s342_s28, [#allocation9], %s1867_s29, %s1867_s29, %s1868_s30  }
  0x1d   : > { %2860 = sst [smem:[#allocation26_spill]] %s1968_s12  ;;  %s41_s17 = ssub.s32 %s1863_s16, %s1968_s12 }
  0x1e   : > { %s44_s18 = sadd.s32 1, %s1859_s15  ;;  %p42_p7 = scmp.eq.s32.totalorder %s41_s17, 0 }
  0x1f   : > { %p51_p8 = scmp.ne.s32.totalorder %s1859_s15, %s1855_s14  ;;  %p52_p9 = scmp.eq.s32.totalorder %s1863_s16, 0 }
  0x20   : > { %p57_p10 = scmp.ne.s32.totalorder %s1855_s14, %s1851_s13  ;;  %p217_p13 = scmp.eq.s32.totalorder %s1949_s20, 1 }
  0x21   : > { %s1979_s22 = scalar_select %p42_p7, %s1859_s15, %s44_s18  }
  0x22   : > { %p1981_p11 = por %p52_p9, %p51_p8  ;;  %p1987_p12 = por %p58_p1, %p57_p10 }
  0x23   : > { %2861 = sst [smem:[#allocation27_spill]] %s1979_s22  ;;  %p223_p0 = scmp.eq.s32.totalorder %s2765_s11, 1 }
  0x24   : > { %p1525_p2 = scmp.lt.s32.totalorder %s1863_s16, 2  ;;  %s355_s23 = sand.u32 1, %s1859_s15  }
  0x25   : > { %p1996_p4 = por %p217_p13, %p51_p8  ;;  %p2000_p6 = por %p223_p0, %p57_p10 }
  0x26   : > { %s2004_s27 = sshll.u32 %s355_s23, 3  ;;  %s1470_s28 = sshll.u32 %s1863_s16, 3 }
  0x27   : > { %s2865_s26 = scalar_select %p2000_p6, 1, 0 }
  0x28   : > { %s364_s17 = scalar_lea.hbm %s2754_s0, %s1470_s28  ;;  %s359_s18 = scalar_lea.vmem [#allocation2], %s2004_s27 }
  0x29   : > { %2866 = sst [smem:[#allocation28_spill]] %s2865_s26  ;;  %s368_s11 = sshll.u32 %s359_s18, 4  ;;  %s369_s11 = int_to_ptr.vmem [resolvable:$true] %s368_s11 }
  0x2a   : > { %s366_s4 = sshll.u32 %s364_s17, 4  ;;  %p2013_p7 = pnand %p1525_p2, %p1981_p11  ;;  %s367_s4 = int_to_ptr.hbm [resolvable:$true] %s366_s4 }
  0x2b   : > { %s384_s12 = scalar_lea.hbm %s2755_s1, %s1470_s28  ;;  %s375_s26 = sand.u32 1, %s1863_s16  }
  0x2c   : > { %s356_s13 = scalar_lea.sflag [#allocation3], %s355_s23  ;;  %s1633_s29 = sshra.s32 %s367_s4, 4  ;;  %s1634_s29 = int_to_ptr.hbm [resolvable:$true] %s1633_s29 }
  0x2d   : > { %s1635_s30 = scalar_lea.hbm %s1634_s29, 8  ;;  %p1637_p9 = pneg %p2013_p7 }
  0x2e   : > { %p1636_p8 = scmp.ne.s32.totalorder %s1634_s29, %s1635_s30  ;;  %s1640_s18 = scalar_lea.hbm %s2754_s0, 16 }
  0x2f   : > { %p1641_p13 = scmp.lt.s32.totalorder %s1634_s29, %s2754_s0  ;;  %p1642_p0 = scmp.lt.s32.totalorder %s1640_s18, %s1635_s30 }
  0x30   : > { %p1638_p10 = pnand %p1637_p9, %p1636_p8 }
  0x31   : > { %p1643_p2 = por %p1642_p0, %p1641_p13 }
  0x32   : > { %p1639_p11 = pneg %p1638_p10 }
  0x34   : > { %p1644_p5 = pnand %p1643_p2, %p1639_p11 }
  0x36   : > { %1647 = shalt.err (!%p1644_p5)
}
  0x37   : > { %1506 = dma.hbm_to_vmem [thread:$0]  (!%p2013_p7), %s367_s4, 128, %s369_s11, %s356_s13  }
  0x38   : > { %s386_s23 = sshll.u32 %s384_s12, 4  ;;  %s379_s28 = scalar_lea.vmem [#allocation5], %s2004_s27  ;;  %s387_s23 = int_to_ptr.hbm [resolvable:$true] %s386_s23 }
  0x39   : > { %s388_s16 = sshll.u32 %s379_s28, 4  ;;  %s376_s24 = scalar_lea.sflag [#allocation6], %s375_s26  ;;  %s389_s16 = int_to_ptr.vmem [resolvable:$true] %s388_s16 }
  0x3a   : > { %s1663_s17 = sshra.s32 %s387_s23, 4  ;;  %s1670_s18 = scalar_lea.hbm %s2755_s1, 16  ;;  %s1664_s17 = int_to_ptr.hbm [resolvable:$true] %s1663_s17 }
  0x3b   : > { %s1665_s10 = scalar_lea.hbm %s1664_s17, 8  ;;  %p1671_p5 = scmp.lt.s32.totalorder %s1664_s17, %s2755_s1 }
  0x3c   : > { %p1666_p8 = scmp.ne.s32.totalorder %s1664_s17, %s1665_s10  ;;  %p1672_p13 = scmp.lt.s32.totalorder %s1670_s18, %s1665_s10 }
  0x3e   : > { %p1668_p10 = pnand %p1666_p8, %p1637_p9  ;;  %p1673_p0 = por %p1672_p13, %p1671_p5 }
  0x40   : > { %p1669_p11 = pneg %p1668_p10 }
  0x42   : > { %p1674_p2 = pnand %p1673_p0, %p1669_p11 }
  0x44   : > { %1677 = shalt.err (!%p1674_p2)
}
  0x45   : > { %1509 = dma.hbm_to_vmem [thread:$0]  (!%p2013_p7), %s387_s23, 128, %s389_s16, %s376_s24  }
  0x46   : > { %397 = sbr.rel (%p1954_p3) target bundleno = 464 (0x1d0), region = 44 }
  0x4b   : > { %s2049_s13 = sand.u32 1, %s1855_s14  }
  0x4c   : > { %s2052_s11 = sshll.u32 %s2049_s13, 3  ;;  %s400_s12 = scalar_lea.sflag [#allocation3], %s2049_s13 }
  0x4d   : > { %s403_s10 = scalar_lea.vmem [#allocation2], %s2052_s11 }
  0x4e   : > { %1822 = dma.done.wait (%p1987_p12), %s400_s12, 128  }
  0x4f   : > { %1824 = vsyncadd (%p1987_p12), %s400_s12, 4294967168  ;;  %s409_s5 = sand.u32 1, %s1949_s20   ;;  %s413_s21 = scalar_lea.vmem [#allocation5], %s2052_s11 }
  0x50   : > { %s410_s16 = scalar_lea.sflag [#allocation6], %s409_s5 }
  0x51   : > { %1826 = dma.done.wait (%p1987_p12), %s410_s16, 128  }
  0x52   : > { %1828 = vsyncadd (%p1987_p12), %s410_s16, 4294967168 }
  0x53   : > { %1830 = dma.done.wait (%p58_p1), [#allocation6], 8192  }
  0x54   : > { %1832 = vsyncadd (%p58_p1), [#allocation6], 4294959104 }
  0x55   : > { %1834 = dma.done.wait (%p58_p1), [#allocation9], 8192  }
  0x56   : > { %1836 = vsyncadd (%p58_p1), [#allocation9], 4294959104  ;;  %v2076_v0 = vld [vmem:[%s403_s10] sm:$0xff]  ;;  %v2078_v1 = vld [vmem:[%s413_s21] sm:$0xff]  ;;  %v1869_v6 = vmov 0   ;;  %vm498_vm0 = vcmask 1043456  }
  0x57   : > { %2868 = vst [vmem:[#allocation29_spill] sm:$0xff] %v2078_v1  ;;  %v491_v2 = vmul.f32 %v2078_v1, %v2076_v0  ;;  %v574_v3 = vld [vmem:[%s2757_s3] sm:$0xf]  ;;  %v2085_v4 = vld [vmem:[#allocation7 + $0xf0] sm:$0xff]  ;;  %1566 = vset.pattern.permute.xlu0 %v1869_v6  ;;  %v2090_v7 = vld [vmem:[#allocation7 + $0xe0] sm:$0xff]  ;;  %v504_v10 = vmul.f32 %v2076_v0, %v2076_v0  ;;  %v529_v21 = vmul.f32 %v2078_v1, %v2078_v1  ;;  %vm584_vm1 = vcmask 31744  }
  0x58   : > { %v2087_v5 = vld [vmem:[#allocation7 + $0x1f0] sm:$0xff]  ;;  %760 = vmatpush.msra.mxu2 %v2085_v4  ;;  %v2092_v8 = vld [vmem:[#allocation7 + $0x1e0] sm:$0xff]  ;;  %577 = vperm.xlu0 %1566, %v574_v3   ;;  %v573_v43 = vld [vmem:[%s2756_s2] sm:$0xf]  ;;  %s2642_s23 = sshll.u32 %s1949_s20, 3  ;;  %s463_s29 = scalar_lea.vmem [#allocation10], %s2052_s11 }
  0x59   : > { %493 = vst [vmem:[#allocation1] ss:$2 sm:$0xff] %v491_v2  ;;  %780 = vmatpush.msra.mxu3 %v2087_v5  ;;  %v2095_v9 = vld [vmem:[#allocation7 + $0xd0] sm:$0xff]  ;;  %v2103_v12 = vld [vmem:[#allocation7 + $0xc0] sm:$0xff]  ;;  %v2193_v44 = vld [vmem:[#allocation7 + $0xf8] sm:$0xff]  ;;  %s1149_s17 = scalar_lea.hbm %s2761_s7, %s2642_s23  ;;  %s2649_s30 = sshll.u32 %s463_s29, 4  ;;  %s1152_s30 = int_to_ptr.vmem [resolvable:$true] %s2649_s30 }
  0x5a   : > { %761 = vmatpush.msra.mxu2 %v2090_v7  ;;  %v2100_v11 = vld [vmem:[#allocation7 + $0x1d0] sm:$0xff]  ;;  %v2106_v13 = vld [vmem:[#allocation7 + $0x1c0] sm:$0xff]  ;;  %v2195_v45 = vld [vmem:[#allocation7 + $0x1f8] sm:$0xff]  ;;  %s2651_s18 = sshll.u32 %s1149_s17, 4  ;;  %s1164_s12 = scalar_lea.hbm %s2762_s8, %s2642_s23  ;;  %s1154_s18 = int_to_ptr.hbm [resolvable:$true] %s2651_s18 }
  0x5b   : > { %781 = vmatpush.msra.mxu3 %v2092_v8  ;;  %v2108_v14 = vld [vmem:[#allocation7 + $0xb0] sm:$0xff]  ;;  %v2119_v18 = vld [vmem:[#allocation7 + $0xa0] sm:$0xff]  ;;  %v2206_v50 = vld [vmem:[#allocation7 + $0xe8] sm:$0xff]  ;;  %s1120_s10 = scalar_lea.sflag [#allocation4], %s2049_s13  ;;  %s1707_s16 = sshra.s32 %s1154_s18, 4  ;;  %s1708_s16 = int_to_ptr.hbm [resolvable:$true] %s1707_s16 }
  0x5c   : > { %762 = vmatpush.msra.mxu2 %v2095_v9  ;;  %v2116_v17 = vld [vmem:[#allocation7 + $0x1b0] sm:$0xff]  ;;  %v2122_v19 = vld [vmem:[#allocation7 + $0x1a0] sm:$0xff]  ;;  %v2208_v51 = vld [vmem:[#allocation7 + $0x1e8] sm:$0xff]  ;;  %s1709_s21 = scalar_lea.hbm %s1708_s16, 8  ;;  %s1713_s27 = scalar_lea.hbm %s2761_s7, 16 }
  0x5d   : > { %782 = vmatpush.msra.mxu3 %v2100_v11  ;;  %v2125_v20 = vld [vmem:[#allocation7 + $0x90] sm:$0xff]  ;;  %v2133_v23 = vld [vmem:[#allocation7 + $0x80] sm:$0xff]  ;;  %v2216_v54 = vld [vmem:[#allocation7 + $0xd8] sm:$0xff]  ;;  %p1710_p1 = scmp.ne.s32.totalorder %s1708_s16, %s1709_s21  ;;  %p1714_p7 = scmp.lt.s32.totalorder %s1708_s16, %s2761_s7 }
  0x5e   : > { %763 = vmatpush.msra.mxu2 %v2103_v12  ;;  %v2130_v22 = vld [vmem:[#allocation7 + $0x190] sm:$0xff]  ;;  %v2136_v24 = vld [vmem:[#allocation7 + $0x180] sm:$0xff]  ;;  %v2218_v55 = vld [vmem:[#allocation7 + $0x1d8] sm:$0xff]  ;;  %p1715_p9 = scmp.lt.s32.totalorder %s1713_s27, %s1709_s21 }
  0x5f   : > { %783 = vmatpush.msra.mxu3 %v2106_v13  ;;  %v2138_v25 = vld [vmem:[#allocation7 + $0x70] sm:$0xff]  ;;  %v2149_v29 = vld [vmem:[#allocation7 + $0x60] sm:$0xff]  ;;  %v2228_v58 = vld [vmem:[#allocation7 + $0xc8] sm:$0xff]  ;;  %p1711_p3 = pnand %p1710_p1, %p1996_p4 }
  0x60   : > { %v2110_v15 = vld.sshfl [vmem:[#allocation1] sm:$0xff pattern:$0x75316420]  ;;  %v2112_v16 = vld.sshfl [vmem:[#allocation1 + $0x8] sm:$0xff pattern:$0x75316420]  ;;  %764 = vmatpush.msra.mxu2 %v2108_v14  ;;  %p1716_p8 = por %p1715_p9, %p1714_p7 }
  0x61   : > { %2869 = vst [vmem:[#allocation30_spill] sm:$0xff] %v2110_v15  ;;  %784 = vmatpush.msra.mxu3 %v2116_v17  ;;  %v2146_v28 = vld [vmem:[#allocation7 + $0x170] sm:$0xff]  ;;  %v2152_v30 = vld [vmem:[#allocation7 + $0x160] sm:$0xff]  ;;  %v2230_v59 = vld [vmem:[#allocation7 + $0x1c8] sm:$0xff]  ;;  %p1712_p12 = pneg %p1711_p3 }
  0x62   : > { %2870 = vst [vmem:[#allocation31_spill] sm:$0xff] %v2112_v16  ;;  %765 = vmatpush.msra.mxu2 %v2119_v18  ;;  %v2155_v31 = vld [vmem:[#allocation7 + $0x50] sm:$0xff]  ;;  %v2161_v33 = vld [vmem:[#allocation7 + $0x40] sm:$0xff]  ;;  %v2240_v62 = vld [vmem:[#allocation7 + $0xb8] sm:$0xff] }
  0x63   : > { %506 = vst [vmem:[#allocation1] ss:$2 sm:$0xff] %v504_v10  ;;  %785 = vmatpush.msra.mxu3 %v2122_v19  ;;  %v2158_v32 = vld [vmem:[#allocation7 + $0x150] sm:$0xff]  ;;  %v2164_v34 = vld [vmem:[#allocation7 + $0x140] sm:$0xff]  ;;  %v2242_v63 = vld [vmem:[#allocation7 + $0x1b8] sm:$0xff]  ;;  %p1717_p10 = pnand %p1716_p8, %p1712_p12 }
  0x64   : > { %766 = vmatpush.msra.mxu2 %v2125_v20  ;;  %v2166_v35 = vld [vmem:[#allocation7 + $0x30] sm:$0xff]  ;;  %v2178_v39 = vld [vmem:[#allocation7 + $0x20] sm:$0xff]  ;;  %v2252_v3 = vld [vmem:[#allocation7 + $0xa8] sm:$0xff] }
  0x65   : > { %786 = vmatpush.msra.mxu3 %v2130_v22  ;;  %v2175_v38 = vld [vmem:[#allocation7 + $0x130] sm:$0xff]  ;;  %2871 = vst [vmem:[#allocation32_spill] sm:$0xff] %v2178_v39  ;;  %v2181_v40 = vld [vmem:[#allocation7 + $0x120] sm:$0xff]  ;;  %v2254_v6 = vld [vmem:[#allocation7 + $0x1a8] sm:$0xff] }
  0x66   : > { %767 = vmatpush.msra.mxu2 %v2133_v23  ;;  %2872 = vst [vmem:[#allocation33_spill] sm:$0xff] %v2181_v40  ;;  %v2184_v41 = vld [vmem:[#allocation7 + $0x10] sm:$0xff]  ;;  %v2202_v48 = vld [vmem:[#allocation7] sm:$0xff]  ;;  %v2276_v15 = vld [vmem:[#allocation7 + $0x88] sm:$0xff] }
  0x67   : > { %787 = vmatpush.msra.mxu3 %v2136_v24  ;;  %2873 = vst [vmem:[#allocation34_spill] sm:$0xff] %v2184_v41  ;;  %v2187_v42 = vld [vmem:[#allocation7 + $0x110] sm:$0xff]  ;;  %v2204_v49 = vld [vmem:[#allocation7 + $0x100] sm:$0xff] }
  0x68   : > { %768 = vmatpush.msra.mxu2 %v2138_v25  ;;  %2874 = vst [vmem:[#allocation35_spill] sm:$0xff] %v2187_v42  ;;  %v2212_v52 = vld [vmem:[#allocation8 + $0xf0] sm:$0xff]  ;;  %v2224_v56 = vld [vmem:[#allocation8 + $0xe0] sm:$0xff] }
  0x69   : > { %788 = vmatpush.msra.mxu3 %v2146_v28  ;;  %2875 = vst [vmem:[#allocation36_spill] sm:$0xff] %v2202_v48  ;;  %v2214_v53 = vld [vmem:[#allocation8 + $0x1f0] sm:$0xff]  ;;  %v2226_v57 = vld [vmem:[#allocation8 + $0x1e0] sm:$0xff] }
  0x6a   : > { %v2140_v26 = vld.sshfl [vmem:[#allocation1] sm:$0xff pattern:$0x75316420]  ;;  %v2142_v27 = vld.sshfl [vmem:[#allocation1 + $0x8] sm:$0xff pattern:$0x75316420]  ;;  %769 = vmatpush.msra.mxu2 %v2149_v29 }
  0x6b   : > { %531 = vst [vmem:[#allocation1] ss:$2 sm:$0xff] %v529_v21  ;;  %789 = vmatpush.msra.mxu3 %v2152_v30  ;;  %v2236_v60 = vld [vmem:[#allocation8 + $0xd0] sm:$0xff]  ;;  %v2250_v2 = vld [vmem:[#allocation8 + $0x1c0] sm:$0xff] }
  0x6c   : > { %770 = vmatpush.msra.mxu2 %v2155_v31  ;;  %2876 = vst [vmem:[#allocation37_spill] sm:$0xff] %v2204_v49  ;;  %v2238_v61 = vld [vmem:[#allocation8 + $0x1d0] sm:$0xff]  ;;  %v2274_v16 = vld [vmem:[#allocation8 + $0x1a0] sm:$0xff] }
  0x6d   : > { %790 = vmatpush.msra.mxu3 %v2158_v32  ;;  %2877 = vst [vmem:[#allocation38_spill] sm:$0xff] %v2212_v52  ;;  %v2260_v10 = vld [vmem:[#allocation8 + $0xb0] sm:$0xff] }
  0x6e   : > { %771 = vmatpush.msra.mxu2 %v2161_v33  ;;  %2878 = vst [vmem:[#allocation39_spill] sm:$0xff] %v2214_v53  ;;  %v2262_v21 = vld [vmem:[#allocation8 + $0x1b0] sm:$0xff] }
  0x6f   : > { %791 = vmatpush.msra.mxu3 %v2164_v34  ;;  %2879 = vst [vmem:[#allocation40_spill] sm:$0xff] %v2224_v56 }
  0x70   : > { %772 = vmatpush.msra.mxu2 %v2166_v35  ;;  %2880 = vst [vmem:[#allocation41_spill] sm:$0xff] %v2226_v57 }
  0x71   : > { %792 = vmatpush.msra.mxu3 %v2175_v38  ;;  %2881 = vst [vmem:[#allocation42_spill] sm:$0xff] %v2236_v60 }
  0x72   : > { %v2168_v36 = vld.sshfl [vmem:[#allocation1] sm:$0xff pattern:$0x75316420]  ;;  %v2170_v37 = vld.sshfl [vmem:[#allocation1 + $0x8] sm:$0xff pattern:$0x75316420]  ;;  %773 = vmatpush.msra.mxu2 %v2178_v39 }
  0x73   : > { %581 = vst [vmem:[#allocation1] ss:$2 sm:$0xff] %v2076_v0  ;;  %793 = vmatpush.msra.mxu3 %v2181_v40  ;;  %v2248_v0 = vld [vmem:[#allocation8 + $0xc0] sm:$0xff]  ;;  %v2338_v40 = vld [vmem:[#allocation7 + $0x138] sm:$0xff]  ;;  %v2348_v39 = vld [vmem:[#allocation7 + $0x28] sm:$0xff] }
  0x74   : > { %774 = vmatpush.msra.mxu2 %v2184_v41  ;;  %2882 = vst [vmem:[#allocation43_spill] sm:$0xff] %v2238_v61  ;;  %v2336_v41 = vld [vmem:[#allocation7 + $0x38] sm:$0xff] }
  0x75   : > { %794 = vmatpush.msra.mxu3 %v2187_v42  ;;  %2883 = vst [vmem:[#allocation44_spill] sm:$0xff] %v2248_v0  ;;  %v2326_v42 = vld [vmem:[#allocation7 + $0x148] sm:$0xff] }
  0x76   : > { %775 = vmatpush.msra.mxu2 %v2202_v48  ;;  %2884 = vst [vmem:[#allocation45_spill] sm:$0xff] %v2250_v2  ;;  %v2324_v48 = vld [vmem:[#allocation7 + $0x48] sm:$0xff] }
  0x77   : > { %795 = vmatpush.msra.mxu3 %v2204_v49  ;;  %2885 = vst [vmem:[#allocation46_spill] sm:$0xff] %v2260_v10  ;;  %v2314_v49 = vld [vmem:[#allocation7 + $0x158] sm:$0xff] }
  0x78   : > { %846 = vmatpush.msrb.mxu2 %v2212_v52  ;;  %2886 = vst [vmem:[#allocation47_spill] sm:$0xff] %v2262_v21  ;;  %v2312_v52 = vld [vmem:[#allocation7 + $0x58] sm:$0xff] }
  0x79   : > { %866 = vmatpush.msrb.mxu3 %v2214_v53  ;;  %2888 = vst [vmem:[#allocation49_spill] sm:$0xff] %v2274_v16  ;;  %v2302_v53 = vld [vmem:[#allocation7 + $0x168] sm:$0xff] }
  0x7a   : > { %v582_v46 = vld.sshfl [vmem:[#allocation1] sm:$0xff pattern:$0x75316420]  ;;  %v583_v47 = vld.sshfl [vmem:[#allocation1 + $0x8] sm:$0xff pattern:$0x75316420]  ;;  %847 = vmatpush.msrb.mxu2 %v2224_v56 }
  0x7b   : > { %1452 = vmatpush.msk.msra.mxu0 %vm498_vm0, %v582_v46  ;;  %1454 = vmatpush.msk.msra.mxu1 %vm498_vm0, %v583_v47  ;;  %933 = vst [vmem:[#allocation1] ss:$2 sm:$0xff] %v2078_v1  ;;  %v2266_v46 = vld [vmem:[#allocation7 + $0x198] sm:$0xff]  ;;  %v2272_v47 = vld [vmem:[#allocation8 + $0xa0] sm:$0xff]  ;;  %v2300_v56 = vld [vmem:[#allocation7 + $0x68] sm:$0xff] }
  0x7c   : > { %1453 = vmatmul.msk.f32.vlgmr.msra.gmra.mxu0 %vm584_vm1, %v573_v43  ;;  %1455 = vmatmul.msk.f32.vlgmr.msra.gmra.mxu1 %vm584_vm1, %v573_v43  ;;  %v2264_v43 = vld [vmem:[#allocation7 + $0x98] sm:$0xff]  ;;  %2887 = vst [vmem:[#allocation48_spill] sm:$0xff] %v2272_v47  ;;  %v2350_v1 = vld [vmem:[#allocation7 + $0x128] sm:$0xff] }
  0x7d   : > { %800 = vmatpush.msrb.mxu0 %v2193_v44  ;;  %820 = vmatpush.msrb.mxu1 %v2195_v45  ;;  %2897 = vst [vmem:[#allocation58_spill] sm:$0xff] %v2324_v48 }
  0x7e   : > { %867 = vmatpush.msrb.mxu3 %v2226_v57  ;;  %848 = vmatpush.msrb.mxu2 %v2236_v60  ;;  %v2288_v60 = vld [vmem:[#allocation7 + $0x78] sm:$0xff]  ;;  %2898 = vst [vmem:[#allocation59_spill] sm:$0xff] %v2326_v42 }
  0x7f   : > { %801 = vmatpush.msrb.mxu0 %v2206_v50  ;;  %821 = vmatpush.msrb.mxu1 %v2208_v51  ;;  %v2290_v57 = vld [vmem:[#allocation7 + $0x178] sm:$0xff]  ;;  %2901 = vst [vmem:[#allocation62_spill] sm:$0xff] %v2336_v41 }
  0x80   : > { %868 = vmatpush.msrb.mxu3 %v2238_v61  ;;  %849 = vmatpush.msrb.mxu2 %v2248_v0  ;;  %v2278_v61 = vld [vmem:[#allocation7 + $0x188] sm:$0xff]  ;;  %v2286_v0 = vld [vmem:[#allocation8 + $0x190] sm:$0xff]  ;;  %2902 = vst [vmem:[#allocation63_spill] sm:$0xff] %v2338_v40 }
  0x81   : > { %802 = vmatpush.msrb.mxu0 %v2216_v54  ;;  %822 = vmatpush.msrb.mxu1 %v2218_v55  ;;  %2890 = vst [vmem:[#allocation51_spill] sm:$0xff] %v2286_v0 }
  0x82   : > { %869 = vmatpush.msrb.mxu3 %v2250_v2  ;;  %850 = vmatpush.msrb.mxu2 %v2260_v10  ;;  %v2284_v2 = vld [vmem:[#allocation8 + $0x90] sm:$0xff]  ;;  %v2298_v10 = vld [vmem:[#allocation8 + $0x180] sm:$0xff]  ;;  %2905 = vst [vmem:[#allocation66_spill] sm:$0xff] %v2348_v39 }
  0x83   : > { %803 = vmatpush.msrb.mxu0 %v2228_v58  ;;  %823 = vmatpush.msrb.mxu1 %v2230_v59  ;;  %2889 = vst [vmem:[#allocation50_spill] sm:$0xff] %v2284_v2 }
  0x84   : > { %870 = vmatpush.msrb.mxu3 %v2262_v21  ;;  %851 = vmatpush.msrb.mxu2 %v2272_v47  ;;  %v2296_v21 = vld [vmem:[#allocation8 + $0x80] sm:$0xff]  ;;  %2892 = vst [vmem:[#allocation53_spill] sm:$0xff] %v2298_v10  ;;  %v2310_v47 = vld [vmem:[#allocation8 + $0x170] sm:$0xff] }
  0x85   : > { %804 = vmatpush.msrb.mxu0 %v2240_v62  ;;  %824 = vmatpush.msrb.mxu1 %v2242_v63  ;;  %2891 = vst [vmem:[#allocation52_spill] sm:$0xff] %v2296_v21 }
  0x86   : > { %871 = vmatpush.msrb.mxu3 %v2274_v16  ;;  %852 = vmatpush.msrb.mxu2 %v2284_v2  ;;  %v2308_v16 = vld [vmem:[#allocation8 + $0x70] sm:$0xff]  ;;  %2894 = vst [vmem:[#allocation55_spill] sm:$0xff] %v2310_v47  ;;  %v2322_v2 = vld [vmem:[#allocation8 + $0x160] sm:$0xff] }
  0x87   : > { %805 = vmatpush.msrb.mxu0 %v2252_v3  ;;  %825 = vmatpush.msrb.mxu1 %v2254_v6  ;;  %2893 = vst [vmem:[#allocation54_spill] sm:$0xff] %v2308_v16 }
  0x88   : > { %872 = vmatpush.msrb.mxu3 %v2286_v0  ;;  %853 = vmatpush.msrb.mxu2 %v2296_v21  ;;  %v2320_v0 = vld [vmem:[#allocation8 + $0x60] sm:$0xff]  ;;  %2896 = vst [vmem:[#allocation57_spill] sm:$0xff] %v2322_v2  ;;  %v2334_v21 = vld [vmem:[#allocation8 + $0x150] sm:$0xff] }
  0x89   : > { %806 = vmatpush.msrb.mxu0 %v2264_v43  ;;  %826 = vmatpush.msrb.mxu1 %v2266_v46  ;;  %2895 = vst [vmem:[#allocation56_spill] sm:$0xff] %v2320_v0 }
  0x8a   : > { %873 = vmatpush.msrb.mxu3 %v2298_v10  ;;  %854 = vmatpush.msrb.mxu2 %v2308_v16  ;;  %v2332_v10 = vld [vmem:[#allocation8 + $0x50] sm:$0xff]  ;;  %2900 = vst [vmem:[#allocation61_spill] sm:$0xff] %v2334_v21  ;;  %v2346_v16 = vld [vmem:[#allocation8 + $0x140] sm:$0xff] }
  0x8b   : > { %807 = vmatpush.msrb.mxu0 %v2276_v15  ;;  %827 = vmatpush.msrb.mxu1 %v2278_v61  ;;  %2899 = vst [vmem:[#allocation60_spill] sm:$0xff] %v2332_v10 }
  0x8c   : > { %874 = vmatpush.msrb.mxu3 %v2310_v47  ;;  %855 = vmatpush.msrb.mxu2 %v2320_v0  ;;  %v2344_v47 = vld [vmem:[#allocation8 + $0x40] sm:$0xff]  ;;  %2904 = vst [vmem:[#allocation65_spill] sm:$0xff] %v2346_v16  ;;  %v2358_v0 = vld [vmem:[#allocation8 + $0x130] sm:$0xff] }
  0x8d   : > { %808 = vmatpush.msrb.mxu0 %v2288_v60  ;;  %828 = vmatpush.msrb.mxu1 %v2290_v57  ;;  %2903 = vst [vmem:[#allocation64_spill] sm:$0xff] %v2344_v47 }
  0x8e   : > { %875 = vmatpush.msrb.mxu3 %v2322_v2  ;;  %2906 = vst [vmem:[#allocation67_spill] sm:$0xff] %v2350_v1  ;;  %856 = vmatpush.msrb.mxu2 %v2332_v10  ;;  %v2356_v2 = vld [vmem:[#allocation8 + $0x30] sm:$0xff]  ;;  %v2370_v10 = vld [vmem:[#allocation8 + $0x120] sm:$0xff] }
  0x8f   : > { %809 = vmatpush.msrb.mxu0 %v2300_v56  ;;  %829 = vmatpush.msrb.mxu1 %v2302_v53  ;;  %2907 = vst [vmem:[#allocation68_spill] sm:$0xff] %v2356_v2 }
  0x90   : > { %876 = vmatpush.msrb.mxu3 %v2334_v21  ;;  %2908 = vst [vmem:[#allocation69_spill] sm:$0xff] %v2358_v0  ;;  %857 = vmatpush.msrb.mxu2 %v2344_v47  ;;  %v2368_v21 = vld [vmem:[#allocation8 + $0x20] sm:$0xff]  ;;  %v2382_v47 = vld [vmem:[#allocation8 + $0x1f8] sm:$0xff] }
  0x91   : > { %810 = vmatpush.msrb.mxu0 %v2312_v52  ;;  %830 = vmatpush.msrb.mxu1 %v2314_v49  ;;  %2910 = vst [vmem:[#allocation71_spill] sm:$0xff] %v2368_v21 }
  0x92   : > { %877 = vmatpush.msrb.mxu3 %v2346_v16  ;;  %2911 = vst [vmem:[#allocation72_spill] sm:$0xff] %v2370_v10  ;;  %858 = vmatpush.msrb.mxu2 %v2356_v2  ;;  %v2380_v16 = vld [vmem:[#allocation8 + $0xf8] sm:$0xff]  ;;  %v2394_v2 = vld [vmem:[#allocation8 + $0x1e8] sm:$0xff] }
  0x93   : > { %811 = vmatpush.msrb.mxu0 %v2324_v48  ;;  %831 = vmatpush.msrb.mxu1 %v2326_v42  ;;  %v2360_v42 = vld [vmem:[#allocation7 + $0x18] sm:$0xff]  ;;  %2913 = vst [vmem:[#allocation74_spill] sm:$0xff] %v2380_v16 }
  0x94   : > { %v2362_v48 = vld [vmem:[#allocation7 + $0x118] sm:$0xff]  ;;  %878 = vmatpush.msrb.mxu3 %v2358_v0  ;;  %2914 = vst [vmem:[#allocation75_spill] sm:$0xff] %v2382_v47  ;;  %859 = vmatpush.msrb.mxu2 %v2368_v21  ;;  %v2392_v0 = vld [vmem:[#allocation8 + $0xe8] sm:$0xff] }
  0x95   : > { %812 = vmatpush.msrb.mxu0 %v2336_v41  ;;  %832 = vmatpush.msrb.mxu1 %v2338_v40  ;;  %2909 = vst [vmem:[#allocation70_spill] sm:$0xff] %v2362_v48  ;;  %v2372_v40 = vld [vmem:[#allocation7 + $0x8] sm:$0xff]  ;;  %v2400_v21 = vld [vmem:[#allocation8 + $0x1d8] sm:$0xff] }
  0x96   : > { %v2374_v41 = vld [vmem:[#allocation7 + $0x108] sm:$0xff]  ;;  %879 = vmatpush.msrb.mxu3 %v2370_v10  ;;  %2917 = vst [vmem:[#allocation78_spill] sm:$0xff] %v2392_v0 }
  0x97   : > { %813 = vmatpush.msrb.mxu0 %v2348_v39  ;;  %833 = vmatpush.msrb.mxu1 %v2350_v1  ;;  %2912 = vst [vmem:[#allocation73_spill] sm:$0xff] %v2374_v41  ;;  %v2386_v1 = vld [vmem:[#allocation8 + $0x10] sm:$0xff]  ;;  %v2406_v10 = vld [vmem:[#allocation8 + $0xc8] sm:$0xff] }
  0x98   : > { %2915 = vst [vmem:[#allocation76_spill] sm:$0xff] %v2386_v1  ;;  %v2388_v39 = vld [vmem:[#allocation8 + $0x110] sm:$0xff]  ;;  %860 = vmatpush.msrb.mxu2 %v2386_v1  ;;  %v2420_v1 = vld [vmem:[#allocation8 + $0x1a8] sm:$0xff] }
  0x99   : > { %814 = vmatpush.msrb.mxu0 %v2360_v42  ;;  %834 = vmatpush.msrb.mxu1 %v2362_v48  ;;  %2916 = vst [vmem:[#allocation77_spill] sm:$0xff] %v2388_v39  ;;  %v2398_v48 = vld [vmem:[#allocation8 + $0xd8] sm:$0xff] }
  0x9a   : > { %2918 = vst [vmem:[#allocation79_spill] sm:$0xff] %v2394_v2  ;;  %880 = vmatpush.msrb.mxu3 %v2388_v39  ;;  %v2418_v39 = vld [vmem:[#allocation8 + $0xa8] sm:$0xff] }
  0x9b   : > { %815 = vmatpush.msrb.mxu0 %v2372_v40  ;;  %835 = vmatpush.msrb.mxu1 %v2374_v41  ;;  %2919 = vst [vmem:[#allocation80_spill] sm:$0xff] %v2398_v48  ;;  %v2408_v41 = vld [vmem:[#allocation8 + $0x1c8] sm:$0xff] }
  0x9c   : > { %2920 = vst [vmem:[#allocation81_spill] sm:$0xff] %v2400_v21 }
  0x9d   : > { %886 = vmatpush.msra.mxu0 %v2380_v16  ;;  %906 = vmatpush.msra.mxu1 %v2382_v47  ;;  %2921 = vst [vmem:[#allocation82_spill] sm:$0xff] %v2406_v10  ;;  %v2412_v47 = vld [vmem:[#allocation8 + $0xb8] sm:$0xff] }
  0x9e   : > { %2922 = vst [vmem:[#allocation83_spill] sm:$0xff] %v2408_v41  ;;  %v2414_v16 = vld [vmem:[#allocation8 + $0x1b8] sm:$0xff] }
  0x9f   : > { %887 = vmatpush.msra.mxu0 %v2392_v0  ;;  %907 = vmatpush.msra.mxu1 %v2394_v2  ;;  %2923 = vst [vmem:[#allocation84_spill] sm:$0xff] %v2412_v47  ;;  %v2424_v2 = vld [vmem:[#allocation8 + $0x98] sm:$0xff] }
  0xa0   : > { %2924 = vst [vmem:[#allocation85_spill] sm:$0xff] %v2414_v16 }
  0xa1   : > { %888 = vmatpush.msra.mxu0 %v2398_v48  ;;  %908 = vmatpush.msra.mxu1 %v2400_v21  ;;  %2925 = vst [vmem:[#allocation86_spill] sm:$0xff] %v2418_v39  ;;  %v2426_v48 = vld [vmem:[#allocation8 + $0x198] sm:$0xff]  ;;  %v2430_v21 = vld [vmem:[#allocation8 + $0x88] sm:$0xff] }
  0xa2   : > { %2926 = vst [vmem:[#allocation87_spill] sm:$0xff] %v2420_v1 }
  0xa3   : > { %889 = vmatpush.msra.mxu0 %v2406_v10  ;;  %909 = vmatpush.msra.mxu1 %v2408_v41  ;;  %2927 = vst [vmem:[#allocation88_spill] sm:$0xff] %v2424_v2  ;;  %v2432_v10 = vld [vmem:[#allocation8 + $0x188] sm:$0xff]  ;;  %v2436_v41 = vld [vmem:[#allocation8 + $0x78] sm:$0xff] }
  0xa4   : > { %2928 = vst [vmem:[#allocation89_spill] sm:$0xff] %v2426_v48 }
  0xa5   : > { %890 = vmatpush.msra.mxu0 %v2412_v47  ;;  %910 = vmatpush.msra.mxu1 %v2414_v16  ;;  %2929 = vst [vmem:[#allocation90_spill] sm:$0xff] %v2430_v21  ;;  %v2438_v47 = vld [vmem:[#allocation8 + $0x178] sm:$0xff]  ;;  %v2442_v16 = vld [vmem:[#allocation8 + $0x68] sm:$0xff] }
  0xa6   : > { %2930 = vst [vmem:[#allocation91_spill] sm:$0xff] %v2432_v10 }
  0xa7   : > { %891 = vmatpush.msra.mxu0 %v2418_v39  ;;  %911 = vmatpush.msra.mxu1 %v2420_v1  ;;  %2931 = vst [vmem:[#allocation92_spill] sm:$0xff] %v2436_v41  ;;  %v2444_v39 = vld [vmem:[#allocation8 + $0x168] sm:$0xff]  ;;  %v2448_v1 = vld [vmem:[#allocation8 + $0x58] sm:$0xff] }
  0xa8   : > { %2932 = vst [vmem:[#allocation93_spill] sm:$0xff] %v2438_v47 }
  0xa9   : > { %892 = vmatpush.msra.mxu0 %v2424_v2  ;;  %912 = vmatpush.msra.mxu1 %v2426_v48  ;;  %2933 = vst [vmem:[#allocation94_spill] sm:$0xff] %v2442_v16  ;;  %v2450_v2 = vld [vmem:[#allocation8 + $0x158] sm:$0xff]  ;;  %v2454_v48 = vld [vmem:[#allocation8 + $0x48] sm:$0xff] }
  0xaa   : > { %2934 = vst [vmem:[#allocation95_spill] sm:$0xff] %v2444_v39 }
  0xab   : > { %893 = vmatpush.msra.mxu0 %v2430_v21  ;;  %913 = vmatpush.msra.mxu1 %v2432_v10  ;;  %2935 = vst [vmem:[#allocation96_spill] sm:$0xff] %v2448_v1  ;;  %v2456_v21 = vld [vmem:[#allocation8 + $0x148] sm:$0xff] }
  0xac   : > { %2936 = vst [vmem:[#allocation97_spill] sm:$0xff] %v2450_v2  ;;  %v2472_v10 = vld [vmem:[#allocation8 + $0x28] sm:$0xff] }
  0xad   : > { %894 = vmatpush.msra.mxu0 %v2436_v41  ;;  %914 = vmatpush.msra.mxu1 %v2438_v47  ;;  %2937 = vst [vmem:[#allocation98_spill] sm:$0xff] %v2454_v48  ;;  %v2462_v47 = vld [vmem:[#allocation8 + $0x38] sm:$0xff] }
  0xae   : > { %2938 = vst [vmem:[#allocation99_spill] sm:$0xff] %v2456_v21  ;;  %v2464_v41 = vld [vmem:[#allocation8 + $0x138] sm:$0xff] }
  0xaf   : > { %895 = vmatpush.msra.mxu0 %v2442_v16  ;;  %915 = vmatpush.msra.mxu1 %v2444_v39  ;;  %2939 = vst [vmem:[#allocation100_spill] sm:$0xff] %v2462_v47  ;;  %v2468_v39 = vld [vmem:[#allocation8] sm:$0xff] }
  0xb0   : > { %2940 = vst [vmem:[#allocation101_spill] sm:$0xff] %v2464_v41  ;;  %v2470_v16 = vld [vmem:[#allocation8 + $0x100] sm:$0xff]  ;;  %861 = vmatpush.msrb.mxu2 %v2468_v39 }
  0xb1   : > { %896 = vmatpush.msra.mxu0 %v2448_v1  ;;  %916 = vmatpush.msra.mxu1 %v2450_v2  ;;  %2941 = vst [vmem:[#allocation102_spill] sm:$0xff] %v2468_v39  ;;  %v511_v39 = vsel %vm498_vm0, %v2140_v26, 0.0  ;;  %v2496_v2 = vld [vmem:[#allocation8 + $0x108] sm:$0xff] }
  0xb2   : > { %2942 = vst [vmem:[#allocation103_spill] sm:$0xff] %v2470_v16  ;;  %881 = vmatpush.msrb.mxu3 %v2470_v16  ;;  %v537_v16 = vsel %vm498_vm0, %v2170_v37, 0.0 }
  0xb3   : > { %897 = vmatpush.msra.mxu0 %v2454_v48  ;;  %917 = vmatpush.msra.mxu1 %v2456_v21  ;;  %2943 = vst [vmem:[#allocation104_spill] sm:$0xff] %v2472_v10  ;;  %v2476_v48 = vld [vmem:[#allocation8 + $0x128] sm:$0xff]  ;;  %v2480_v21 = vld [vmem:[#allocation8 + $0x18] sm:$0xff] }
  0xb4   : > { %2944 = vst [vmem:[#allocation105_spill] sm:$0xff] %v2476_v48 }
  0xb5   : > { %898 = vmatpush.msra.mxu0 %v2462_v47  ;;  %918 = vmatpush.msra.mxu1 %v2464_v41  ;;  %2945 = vst [vmem:[#allocation106_spill] sm:$0xff] %v2480_v21  ;;  %v2482_v47 = vld [vmem:[#allocation8 + $0x118] sm:$0xff]  ;;  %v536_v41 = vsel %vm498_vm0, %v2168_v36, 0.0 }
  0xb6   : > { %2946 = vst [vmem:[#allocation107_spill] sm:$0xff] %v2482_v47  ;;  %v538_v1 = vadd.f32 %v537_v16, %v536_v41  ;;  %v2956_v16 = vld [vmem:[#allocation66_spill] sm:$0xff]  ;;  %v2977_v41 = vld [vmem:[#allocation81_spill] sm:$0xff] }
  0xb7   : > { %899 = vmatpush.msra.mxu0 %v2472_v10  ;;  %919 = vmatpush.msra.mxu1 %v2476_v48  ;;  %v512_v48 = vsel %vm498_vm0, %v2142_v27, 0.0  ;;  %v2494_v10 = vld [vmem:[#allocation8 + $0x8] sm:$0xff]  ;;  %v2965_v27 = vld [vmem:[#allocation73_spill] sm:$0xff] }
  0xb8   : > { %539 = vadd.xlane.f32.xlu1 %v538_v1  ;;  %v2546_v1 = vld.sshfl [vmem:[#allocation1] sm:$0xff pattern:$0x75316420] }
  0xb9   : > { %900 = vmatpush.msra.mxu0 %v2480_v21  ;;  %920 = vmatpush.msra.mxu1 %v2482_v47  ;;  %v513_v21 = vadd.f32 %v512_v48, %v511_v39  ;;  %v2975_v39 = vld [vmem:[#allocation47_spill] sm:$0xff] }
  0xbb   : > { %901 = vmatpush.msra.mxu0 %v2494_v10  ;;  %921 = vmatpush.msra.mxu1 %v2496_v2 }
  0xbc   : > { %514 = vadd.xlane.f32.xlu0 %v513_v21  ;;  %v2997_v21 = vld [vmem:[#allocation57_spill] sm:$0xff] }
  0xca   : > { %v578_v36 = vpop.permute.xlu0 %577 }
  0xf9   : > { %v609_v37 = vpop.f32.mrf.mxu0  ;;  %v629_v47 = vpop.f32.mrf.mxu1 }
  0xfa   : > { %v610_v0 = vadd.f32 %v609_v37, %v578_v36  ;;  %v630_v26 = vadd.f32 %v629_v47, %v578_v36  ;;  %v3000_v47 = vld [vmem:[#allocation60_spill] sm:$0xff]  ;;  %v3001_v36 = vld [vmem:[#allocation61_spill] sm:$0xff] }
  0xfb   : > { %v3002_v37 = vld [vmem:[#allocation92_spill] sm:$0xff] }
  0xfc   : > { %776 = vmatmul.f32.vlgmr.msra.gmra.mxu2 %v610_v0  ;;  %796 = vmatmul.f32.vlgmr.msra.gmra.mxu3 %v630_v26 }
  0xfd   : > { %816 = vmatmul.f32.vlgmr.msrb.gmra.mxu0 %v610_v0  ;;  %836 = vmatmul.f32.vlgmr.msrb.gmra.mxu1 %v630_v26 }
  0xfe   : > { %938 = vmatpush.msra.mxu2 %v2085_v4  ;;  %958 = vmatpush.msra.mxu3 %v2087_v5  ;;  %v2548_v4 = vld.sshfl [vmem:[#allocation1 + $0x8] sm:$0xff pattern:$0x75316420] }
  0xff   : > { %978 = vmatpush.msrb.mxu0 %v2193_v44  ;;  %998 = vmatpush.msrb.mxu1 %v2195_v45  ;;  %v2947_v5 = vld [vmem:[#allocation29_spill] sm:$0xff]  ;;  %v2979_v45 = vld [vmem:[#allocation31_spill] sm:$0xff] }
 0x100   : > { %939 = vmatpush.msra.mxu2 %v2090_v7  ;;  %959 = vmatpush.msra.mxu3 %v2092_v8  ;;  %1024 = vst [vmem:[#allocation1] ss:$2 sm:$0xff] %v2947_v5  ;;  %v2948_v7 = vld [vmem:[#allocation58_spill] sm:$0xff]  ;;  %v2949_v8 = vld [vmem:[#allocation59_spill] sm:$0xff]  ;;  %v500_v48 = vsel %vm498_vm0, %v2979_v45, 0.0  ;;  %v3004_v5 = vld [vmem:[#allocation64_spill] sm:$0xff] }
 0x101   : > { %979 = vmatpush.msrb.mxu0 %v2206_v50  ;;  %999 = vmatpush.msrb.mxu1 %v2208_v51  ;;  %v2981_v50 = vld [vmem:[#allocation49_spill] sm:$0xff]  ;;  %v2982_v51 = vld [vmem:[#allocation82_spill] sm:$0xff] }
 0x102   : > { %940 = vmatpush.msra.mxu2 %v2095_v9  ;;  %960 = vmatpush.msra.mxu3 %v2100_v11  ;;  %v2950_v9 = vld [vmem:[#allocation32_spill] sm:$0xff]  ;;  %v2951_v11 = vld [vmem:[#allocation33_spill] sm:$0xff] }
 0x103   : > { %980 = vmatpush.msrb.mxu0 %v2216_v54  ;;  %1000 = vmatpush.msrb.mxu1 %v2218_v55  ;;  %v2985_v54 = vld [vmem:[#allocation51_spill] sm:$0xff] }
 0x104   : > { %941 = vmatpush.msra.mxu2 %v2103_v12  ;;  %961 = vmatpush.msra.mxu3 %v2106_v13  ;;  %v2952_v12 = vld [vmem:[#allocation62_spill] sm:$0xff]  ;;  %v2953_v13 = vld [vmem:[#allocation63_spill] sm:$0xff] }
 0x105   : > { %862 = vmatmul.f32.vlgmr.msrb.gmra.mxu2 %v610_v0  ;;  %882 = vmatmul.f32.vlgmr.msrb.gmra.mxu3 %v630_v26 }
 0x106   : > { %902 = vmatmul.f32.vlgmr.msra.gmra.mxu0 %v610_v0  ;;  %922 = vmatmul.f32.vlgmr.msra.gmra.mxu1 %v630_v26  ;;  %v2994_v0 = vld [vmem:[#allocation88_spill] sm:$0xff]  ;;  %v3003_v26 = vld [vmem:[#allocation93_spill] sm:$0xff] }
 0x107   : > { %942 = vmatpush.msra.mxu2 %v2108_v14  ;;  %962 = vmatpush.msra.mxu3 %v2116_v17  ;;  %v2954_v14 = vld [vmem:[#allocation34_spill] sm:$0xff]  ;;  %v2957_v17 = vld [vmem:[#allocation67_spill] sm:$0xff] }
 0x108   : > { %981 = vmatpush.msrb.mxu0 %v2228_v58  ;;  %1001 = vmatpush.msrb.mxu1 %v2230_v59  ;;  %v2988_v58 = vld [vmem:[#allocation52_spill] sm:$0xff]  ;;  %v2989_v59 = vld [vmem:[#allocation53_spill] sm:$0xff] }
 0x109   : > { %943 = vmatpush.msra.mxu2 %v2119_v18  ;;  %963 = vmatpush.msra.mxu3 %v2122_v19  ;;  %v2958_v18 = vld [vmem:[#allocation36_spill] sm:$0xff]  ;;  %v2959_v19 = vld [vmem:[#allocation37_spill] sm:$0xff] }
 0x10a   : > { %982 = vmatpush.msrb.mxu0 %v2240_v62  ;;  %1002 = vmatpush.msrb.mxu1 %v2242_v63  ;;  %v2992_v62 = vld [vmem:[#allocation54_spill] sm:$0xff]  ;;  %v2993_v63 = vld [vmem:[#allocation55_spill] sm:$0xff] }
 0x10b   : > { %944 = vmatpush.msra.mxu2 %v2125_v20  ;;  %964 = vmatpush.msra.mxu3 %v2130_v22  ;;  %v2960_v20 = vld [vmem:[#allocation38_spill] sm:$0xff]  ;;  %v2961_v22 = vld [vmem:[#allocation39_spill] sm:$0xff] }
 0x10c   : > { %983 = vmatpush.msrb.mxu0 %v2252_v3  ;;  %1003 = vmatpush.msrb.mxu1 %v2254_v6  ;;  %v2995_v3 = vld [vmem:[#allocation89_spill] sm:$0xff]  ;;  %v2996_v6 = vld [vmem:[#allocation56_spill] sm:$0xff] }
 0x10d   : > { %945 = vmatpush.msra.mxu2 %v2133_v23  ;;  %965 = vmatpush.msra.mxu3 %v2136_v24  ;;  %v2962_v23 = vld [vmem:[#allocation70_spill] sm:$0xff]  ;;  %v2963_v24 = vld [vmem:[#allocation40_spill] sm:$0xff] }
 0x10e   : > { %984 = vmatpush.msrb.mxu0 %v2264_v43  ;;  %1004 = vmatpush.msrb.mxu1 %v2266_v46  ;;  %v2998_v43 = vld [vmem:[#allocation90_spill] sm:$0xff]  ;;  %v2999_v46 = vld [vmem:[#allocation91_spill] sm:$0xff] }
 0x10f   : > { %946 = vmatpush.msra.mxu2 %v2138_v25  ;;  %966 = vmatpush.msra.mxu3 %v2146_v28  ;;  %v2964_v25 = vld [vmem:[#allocation41_spill] sm:$0xff]  ;;  %v2966_v28 = vld [vmem:[#allocation42_spill] sm:$0xff] }
 0x110   : > { %985 = vmatpush.msrb.mxu0 %v2276_v15  ;;  %1005 = vmatpush.msrb.mxu1 %v2278_v61  ;;  %v2955_v15 = vld [vmem:[#allocation35_spill] sm:$0xff] }
 0x111   : > { %947 = vmatpush.msra.mxu2 %v2149_v29  ;;  %967 = vmatpush.msra.mxu3 %v2152_v30  ;;  %v2967_v29 = vld [vmem:[#allocation43_spill] sm:$0xff]  ;;  %v2968_v30 = vld [vmem:[#allocation74_spill] sm:$0xff] }
 0x112   : > { %986 = vmatpush.msrb.mxu0 %v2288_v60  ;;  %1006 = vmatpush.msrb.mxu1 %v2290_v57  ;;  %v2987_v57 = vld [vmem:[#allocation85_spill] sm:$0xff]  ;;  %v2990_v60 = vld [vmem:[#allocation86_spill] sm:$0xff]  ;;  %v2991_v61 = vld [vmem:[#allocation87_spill] sm:$0xff] }
 0x113   : > { %948 = vmatpush.msra.mxu2 %v2155_v31  ;;  %968 = vmatpush.msra.mxu3 %v2158_v32  ;;  %v2969_v31 = vld [vmem:[#allocation75_spill] sm:$0xff]  ;;  %v2970_v32 = vld [vmem:[#allocation44_spill] sm:$0xff] }
 0x114   : > { %987 = vmatpush.msrb.mxu0 %v2300_v56  ;;  %1007 = vmatpush.msrb.mxu1 %v2302_v53  ;;  %v2984_v53 = vld [vmem:[#allocation50_spill] sm:$0xff]  ;;  %v2986_v56 = vld [vmem:[#allocation84_spill] sm:$0xff] }
 0x115   : > { %949 = vmatpush.msra.mxu2 %v2161_v33  ;;  %969 = vmatpush.msra.mxu3 %v2164_v34  ;;  %v2971_v33 = vld [vmem:[#allocation45_spill] sm:$0xff]  ;;  %v2972_v34 = vld [vmem:[#allocation78_spill] sm:$0xff] }
 0x116   : > { %988 = vmatpush.msrb.mxu0 %v2312_v52  ;;  %1008 = vmatpush.msrb.mxu1 %v2314_v49  ;;  %v2980_v49 = vld [vmem:[#allocation48_spill] sm:$0xff]  ;;  %v2983_v52 = vld [vmem:[#allocation83_spill] sm:$0xff] }
 0x117   : > { %950 = vmatpush.msra.mxu2 %v2166_v35  ;;  %970 = vmatpush.msra.mxu3 %v2175_v38  ;;  %v2973_v35 = vld [vmem:[#allocation79_spill] sm:$0xff]  ;;  %v2974_v38 = vld [vmem:[#allocation46_spill] sm:$0xff] }
 0x118   : > { %989 = vmatpush.msrb.mxu0 %v2948_v7  ;;  %1009 = vmatpush.msrb.mxu1 %v2949_v8  ;;  %v3005_v7 = vld [vmem:[#allocation65_spill] sm:$0xff]  ;;  %v3006_v8 = vld [vmem:[#allocation94_spill] sm:$0xff] }
 0x119   : > { %951 = vmatpush.msra.mxu2 %v2950_v9  ;;  %971 = vmatpush.msra.mxu3 %v2951_v11  ;;  %v3007_v9 = vld [vmem:[#allocation95_spill] sm:$0xff]  ;;  %v3008_v11 = vld [vmem:[#allocation68_spill] sm:$0xff] }
 0x11a   : > { %990 = vmatpush.msrb.mxu0 %v2952_v12  ;;  %1010 = vmatpush.msrb.mxu1 %v2953_v13  ;;  %v3009_v12 = vld [vmem:[#allocation69_spill] sm:$0xff]  ;;  %v3010_v13 = vld [vmem:[#allocation96_spill] sm:$0xff] }
 0x11b   : > { %952 = vmatpush.msra.mxu2 %v2954_v14  ;;  %972 = vmatpush.msra.mxu3 %v2955_v15  ;;  %v3011_v14 = vld [vmem:[#allocation97_spill] sm:$0xff]  ;;  %v3012_v15 = vld [vmem:[#allocation71_spill] sm:$0xff] }
 0x11c   : > { %991 = vmatpush.msrb.mxu0 %v2956_v16  ;;  %1011 = vmatpush.msrb.mxu1 %v2957_v17  ;;  %v3013_v16 = vld [vmem:[#allocation72_spill] sm:$0xff]  ;;  %v3014_v17 = vld [vmem:[#allocation98_spill] sm:$0xff] }
 0x11d   : > { %953 = vmatpush.msra.mxu2 %v2958_v18  ;;  %973 = vmatpush.msra.mxu3 %v2959_v19  ;;  %v3015_v18 = vld [vmem:[#allocation99_spill] sm:$0xff]  ;;  %v3016_v19 = vld [vmem:[#allocation76_spill] sm:$0xff] }
 0x11e   : > { %992 = vmatpush.msrb.mxu0 %v2360_v42  ;;  %1012 = vmatpush.msrb.mxu1 %v2962_v23  ;;  %v2978_v42 = vld [vmem:[#allocation30_spill] sm:$0xff]  ;;  %v1025_v23 = vld.sshfl [vmem:[#allocation1] sm:$0xff pattern:$0x75316420] }
 0x11f   : > { %1029 = vmatpush.msrb.mxu2 %v2960_v20  ;;  %1049 = vmatpush.msrb.mxu3 %v2961_v22  ;;  %v499_v44 = vsel %vm498_vm0, %v2978_v42, 0.0  ;;  %v3017_v20 = vld [vmem:[#allocation77_spill] sm:$0xff]  ;;  %v3018_v22 = vld [vmem:[#allocation100_spill] sm:$0xff] }
 0x120   : > { %993 = vmatpush.msrb.mxu0 %v2372_v40  ;;  %1013 = vmatpush.msrb.mxu1 %v2965_v27  ;;  %v2976_v40 = vld [vmem:[#allocation80_spill] sm:$0xff]  ;;  %v501_v55 = vadd.f32 %v500_v48, %v499_v44  ;;  %v1026_v27 = vld.sshfl [vmem:[#allocation1 + $0x8] sm:$0xff pattern:$0x75316420] }
 0x121   : > { %1030 = vmatpush.msrb.mxu2 %v2963_v24  ;;  %1050 = vmatpush.msrb.mxu3 %v2964_v25  ;;  %v3019_v24 = vld [vmem:[#allocation101_spill] sm:$0xff]  ;;  %v3020_v25 = vld [vmem:[#allocation102_spill] sm:$0xff] }
 0x122   : > { %1069 = vmatpush.msra.mxu0 %v2968_v30  ;;  %1089 = vmatpush.msra.mxu1 %v2969_v31  ;;  %v3023_v30 = vld [vmem:[#allocation105_spill] sm:$0xff] }
 0x123   : > { %1031 = vmatpush.msrb.mxu2 %v2966_v28  ;;  %1051 = vmatpush.msrb.mxu3 %v2967_v29  ;;  %v3021_v28 = vld [vmem:[#allocation103_spill] sm:$0xff]  ;;  %v3022_v29 = vld [vmem:[#allocation104_spill] sm:$0xff] }
 0x124   : > { %1070 = vmatpush.msra.mxu0 %v2972_v34  ;;  %1090 = vmatpush.msra.mxu1 %v2973_v35 }
 0x125   : > { %1032 = vmatpush.msrb.mxu2 %v2970_v32  ;;  %1052 = vmatpush.msrb.mxu3 %v2971_v33 }
 0x126   : > { %1071 = vmatpush.msra.mxu0 %v2976_v40  ;;  %1091 = vmatpush.msra.mxu1 %v2977_v41 }
 0x127   : > { %1033 = vmatpush.msrb.mxu2 %v2974_v38  ;;  %1053 = vmatpush.msrb.mxu3 %v2975_v39 }
 0x128   : > { %1072 = vmatpush.msra.mxu0 %v2982_v51  ;;  %1092 = vmatpush.msra.mxu1 %v2983_v52 }
 0x129   : > { %1034 = vmatpush.msrb.mxu2 %v2980_v49  ;;  %1054 = vmatpush.msrb.mxu3 %v2981_v50 }
 0x12a   : > { %1073 = vmatpush.msra.mxu0 %v2986_v56  ;;  %1093 = vmatpush.msra.mxu1 %v2987_v57 }
 0x12b   : > { %1035 = vmatpush.msrb.mxu2 %v2984_v53  ;;  %1055 = vmatpush.msrb.mxu3 %v2985_v54  ;;  %v540_v31 = vpop.xlane.xlu1 %539 }
 0x12c   : > { %1074 = vmatpush.msra.mxu0 %v2990_v60  ;;  %1094 = vmatpush.msra.mxu1 %v2991_v61  ;;  %1567 = vrsqrt.f32 %v540_v31  ;;  %vm548_vm2 = vcmp.eq.f32.partialorder %v540_v31, inf  ;;  %v551_v50 = vand.u32 2147483648, %v540_v31  ;;  %vm550_vm4 = vcmp.eq.f32.partialorder %v540_v31, 0.0 }
 0x12d   : > { %1036 = vmatpush.msrb.mxu2 %v2988_v58  ;;  %1056 = vmatpush.msrb.mxu3 %v2989_v59 }
 0x12e   : > { %502 = vadd.xlane.f32.xlu1 %v501_v55  ;;  %1075 = vmatpush.msra.mxu0 %v2994_v0 }
 0x12f   : > { %1037 = vmatpush.msrb.mxu2 %v2992_v62  ;;  %1057 = vmatpush.msrb.mxu3 %v2993_v63  ;;  %v515_v32 = vpop.xlane.xlu0 %514 }
 0x130   : > { %1095 = vmatpush.msra.mxu1 %v2995_v3  ;;  %1076 = vmatpush.msra.mxu0 %v2998_v43  ;;  %1569 = vrsqrt.f32 %v515_v32  ;;  %vm523_vm3 = vcmp.eq.f32.partialorder %v515_v32, inf  ;;  %v526_v51 = vand.u32 2147483648, %v515_v32  ;;  %vm525_vm5 = vcmp.eq.f32.partialorder %v515_v32, 0.0 }
 0x131   : > { %1038 = vmatpush.msrb.mxu2 %v2996_v6  ;;  %1058 = vmatpush.msrb.mxu3 %v2997_v21 }
 0x132   : > { %1096 = vmatpush.msra.mxu1 %v2999_v46  ;;  %1077 = vmatpush.msra.mxu0 %v3002_v37  ;;  %v1568_v33 = vpop.eup %1567 }
 0x133   : > { %1039 = vmatpush.msrb.mxu2 %v3000_v47  ;;  %1059 = vmatpush.msrb.mxu3 %v3001_v36  ;;  %v542_v35 = vmul.f32 %v1568_v33, %v540_v31 }
 0x134   : > { %1097 = vmatpush.msra.mxu1 %v3003_v26  ;;  %1078 = vmatpush.msra.mxu0 %v3006_v8 }
 0x135   : > { %1040 = vmatpush.msrb.mxu2 %v3004_v5  ;;  %1060 = vmatpush.msrb.mxu3 %v3005_v7  ;;  %v543_v39 = vmul.f32 %v1568_v33, %v542_v35 }
 0x136   : > { %1098 = vmatpush.msra.mxu1 %v3007_v9  ;;  %954 = vmatmul.f32.vlgmr.msra.gmra.mxu2 %v2546_v1  ;;  %v1570_v34 = vpop.eup %1569 }
 0x137   : > { %974 = vmatmul.f32.vlgmr.msra.gmra.mxu3 %v2548_v4  ;;  %1041 = vmatpush.msrb.mxu2 %v3008_v11  ;;  %v517_v38 = vmul.f32 %v1570_v34, %v515_v32  ;;  %v544_v41 = vmul.f32 0.5, %v543_v39 }
 0x138   : > { %1061 = vmatpush.msrb.mxu3 %v3009_v12  ;;  %1079 = vmatpush.msra.mxu0 %v3010_v13 }
 0x139   : > { %1099 = vmatpush.msra.mxu1 %v3011_v14  ;;  %1042 = vmatpush.msrb.mxu2 %v3012_v15  ;;  %v518_v40 = vmul.f32 %v1570_v34, %v517_v38  ;;  %v545_v44 = vsub.f32 1.5, %v544_v41 }
 0x13a   : > { %1062 = vmatpush.msrb.mxu3 %v3013_v16  ;;  %1080 = vmatpush.msra.mxu0 %v3014_v17 }
 0x13b   : > { %1100 = vmatpush.msra.mxu1 %v3015_v18  ;;  %994 = vmatmul.f32.vlgmr.msrb.gmra.mxu0 %v2546_v1  ;;  %v3024_v1 = vld [vmem:[#allocation106_spill] sm:$0xff]  ;;  %v519_v42 = vmul.f32 0.5, %v518_v40 }
 0x13c   : > { %1014 = vmatmul.f32.vlgmr.msrb.gmra.mxu1 %v2548_v4  ;;  %1043 = vmatpush.msrb.mxu2 %v3016_v19  ;;  %v3025_v4 = vld [vmem:[#allocation107_spill] sm:$0xff] }
 0x13d   : > { %1063 = vmatpush.msrb.mxu3 %v3017_v20  ;;  %1081 = vmatpush.msra.mxu0 %v3018_v22  ;;  %v520_v45 = vsub.f32 1.5, %v519_v42 }
 0x13e   : > { %1101 = vmatpush.msra.mxu1 %v3019_v24  ;;  %1044 = vmatpush.msrb.mxu2 %v3020_v25 }
 0x13f   : > { %1064 = vmatpush.msrb.mxu3 %v3021_v28  ;;  %1082 = vmatpush.msra.mxu0 %v3022_v29  ;;  %v521_v48 = vmul.f32 %v1570_v34, %v520_v45 }
 0x140   : > { %1102 = vmatpush.msra.mxu1 %v3023_v30  ;;  %1045 = vmatmul.f32.vlgmr.msrb.gmra.mxu2 %v1025_v23 }
 0x141   : > { %1065 = vmatmul.f32.vlgmr.msrb.gmra.mxu3 %v1026_v27  ;;  %1083 = vmatpush.msra.mxu0 %v3024_v1  ;;  %v522_v49 = vmul.f32 %v521_v48, %v515_v32 }
 0x142   : > { %1103 = vmatpush.msra.mxu1 %v3025_v4 }
 0x143   : > { %1084 = vmatpush.msra.mxu0 %v2494_v10  ;;  %v546_v10 = vmul.f32 %v1568_v33, %v545_v44  ;;  %v524_v53 = vsel %vm523_vm3, %v515_v32, %v522_v49 }
 0x144   : > { %1104 = vmatpush.msra.mxu1 %v2496_v2  ;;  %1085 = vmatmul.f32.vlgmr.msra.gmra.mxu0 %v1025_v23  ;;  %v527_v55 = vsel %vm525_vm5, %v526_v51, %v524_v53 }
 0x145   : > { %1105 = vmatmul.f32.vlgmr.msra.gmra.mxu1 %v1026_v27  ;;  %v547_v2 = vmul.f32 %v546_v10, %v540_v31  ;;  %v528_v59 = vmax.f32 %v527_v55, 1e-08 }
 0x147   : > { %v549_v52 = vsel %vm548_vm2, %v540_v31, %v547_v2 }
 0x148   : > { %v552_v54 = vsel %vm550_vm4, %v551_v50, %v549_v52 }
 0x149   : > { %v553_v58 = vmax.f32 %v552_v54, 1e-08 }
 0x14b   : > { %v2653_v61 = vmul.f32 %v553_v58, %v528_v59 }
 0x14d   : > { %1571 = vrcp.f32 %v2653_v61 }
 0x17a   : > { %v817_v56 = vpop.f32.mrf.mxu0  ;;  %v837_v57 = vpop.f32.mrf.mxu1 }
 0x17b   : > { %v838_v60 = vadd.f32 %v837_v57, %v817_v56 }
 0x17d   : > { %v842_v0 = vrot.slane %v838_v60, 4 }
 0x17f   : > { %v777_v62 = vpop.f32.mrf.mxu2  ;;  %v797_v63 = vpop.f32.mrf.mxu3 }
 0x180   : > { %v798_v3 = vadd.f32 %v797_v63, %v777_v62 }
 0x182   : > { %v843_v6 = vsel %vm498_vm0, %v798_v3, %v842_v0 }
 0x183   : > { %v903_v21 = vpop.f32.mrf.mxu0  ;;  %v923_v43 = vpop.f32.mrf.mxu1  ;;  %845 = vst [vmem:[%s463_s29] sm:$0xff] %v843_v6 }
 0x184   : > { %1720 = shalt.err (!%p1717_p10)
}
 0x185   : > { %1488 = dma.vmem_to_hbm [thread:$0]  (%p1996_p4), %s1152_s30, 128, %s1154_s18, %s1120_s10   ;;  %v924_v46 = vadd.f32 %v923_v43, %v903_v21  ;;  %v1572_v37 = vpop.eup %1571 }
 0x186   : > { %s470_s24 = scalar_lea.vmem [#allocation11], %s2052_s11  ;;  %s1168_s29 = sshll.u32 %s1164_s12, 4  ;;  %v556_v8 = vmul.f32 %v1572_v37, %v2653_v61  ;;  %s1169_s29 = int_to_ptr.hbm [resolvable:$true] %s1168_s29 }
 0x187   : > { %s1166_s17 = sshll.u32 %s470_s24, 4  ;;  %v928_v26 = vrot.slane %v924_v46, 4  ;;  %s2679_s15 = scalar_lea.sflag [#allocation12], %s409_s5  ;;  %s1167_s17 = int_to_ptr.vmem [resolvable:$true] %s1166_s17 }
 0x188   : > { %v863_v47 = vpop.f32.mrf.mxu2  ;;  %v883_v36 = vpop.f32.mrf.mxu3  ;;  %s1735_s30 = sshra.s32 %s1169_s29, 4  ;;  %s1741_s10 = scalar_lea.hbm %s2762_s8, 16  ;;  %s1736_s30 = int_to_ptr.hbm [resolvable:$true] %s1735_s30 }
 0x189   : > { %v884_v5 = vadd.f32 %v883_v36, %v863_v47  ;;  %s1737_s18 = scalar_lea.hbm %s1736_s30, 8  ;;  %p1742_p0 = scmp.lt.s32.totalorder %s1736_s30, %s2762_s8 }
 0x18a   : > { %p1738_p11 = scmp.ne.s32.totalorder %s1736_s30, %s1737_s18  ;;  %p1743_p2 = scmp.lt.s32.totalorder %s1741_s10, %s1737_s18 }
 0x18b   : > { %v929_v7 = vsel %vm498_vm0, %v884_v5, %v928_v26 }
 0x18c   : > { %931 = vst [vmem:[%s470_s24] sm:$0xff] %v929_v7  ;;  %p1739_p5 = pnand %p1738_p11, %p1996_p4  ;;  %p1744_p1 = por %p1743_p2, %p1742_p0 }
 0x18e   : > { %p1740_p13 = pneg %p1739_p5 }
 0x190   : > { %p1745_p3 = pnand %p1744_p1, %p1740_p13 }
 0x192   : > { %1748 = shalt.err (!%p1745_p3)
}
 0x193   : > { %1489 = dma.vmem_to_hbm [thread:$0]  (%p1996_p4), %s1167_s17, 128, %s1169_s29, %s2679_s15   ;;  %v557_v9 = vsub.f32 1.0, %v556_v8  ;;  %vm560_vm6 = vweird.f32 %v2653_v61  ;;  %vm561_vm7 = vweird.f32 %v1572_v37  ;;  %v566_v12 = vand.u32 2147483648, %v2653_v61 }
 0x194   : > { %p485_p12 = scmp.lt.s32.totalorder %s1949_s20, 1  ;;  %v564_v14 = vand.u32 2147483647, %v2653_v61  ;;  %vm562_vm8 = vmor %vm560_vm6, %vm561_vm7  ;;  %vm571_vm10 = vcmask 3072   ;;  %s1179_s24 = scalar_lea.hbm %s2763_s9, %s2642_s23 }
 0x195   : > { %v558_v11 = vmul.f32 %v1572_v37, %v557_v9  ;;  %v567_v15 = vor.u32 1.1754944e-38, %v566_v12  ;;  %s1183_s29 = sshll.u32 %s1179_s24, 4  ;;  %s3026_s4 = sld [smem:[#allocation110_spill]]  ;;  %s1184_s29 = int_to_ptr.hbm [resolvable:$true] %s1183_s29 }
 0x196   : > { %s3038_s20 = smov (!%p485_p12, %s1949_s20), 1  ;;  %vm565_vm9 = vcmp.eq.f32.partialorder %v564_v14, 8.507059e+37  ;;  %s1763_s10 = sshra.s32 %s1184_s29, 4  ;;  %s1764_s10 = int_to_ptr.hbm [resolvable:$true] %s1763_s10 }
 0x197   : > { %v559_v13 = vadd.f32 %v1572_v37, %v558_v11  ;;  %s1451_s5 = sshll.u32 %s3038_s20, 2  ;;  %s477_s20 = scalar_lea.vmem [#allocation13], %s2052_s11 }
 0x198   : > { %s488_s27 = scalar_lea.vmem %s2760_s6, %s1451_s5  ;;  %s1181_s17 = sshll.u32 %s477_s20, 4  ;;  %s1182_s17 = int_to_ptr.vmem [resolvable:$true] %s1181_s17 }
 0x199   : > { %v563_v16 = vsel %vm562_vm8, %v1572_v37, %v559_v13  ;;  %s1765_s16 = scalar_lea.hbm %s1764_s10, 8  ;;  %s1769_s19 = scalar_lea.hbm %s2763_s9, 16 }
 0x19a   : > { %v568_v17 = vsel %vm565_vm9, %v567_v15, %v563_v16  ;;  %p1766_p7 = scmp.ne.s32.totalorder %s1764_s10, %s1765_s16  ;;  %p1770_p10 = scmp.lt.s32.totalorder %s1764_s10, %s2763_s9 }
 0x19b   : > { %s1194_s12 = scalar_lea.hbm %s3026_s4, %s2642_s23  ;;  %p1771_p11 = scmp.lt.s32.totalorder %s1769_s19, %s1765_s16 }
 0x19c   : > { %p1767_p9 = pnand %p1766_p7, %p1996_p4 }
 0x19d   : > { %p1772_p5 = por %p1771_p11, %p1770_p10 }
 0x19e   : > { %p1768_p8 = pneg %p1767_p9 }
 0x1a0   : > { %p1773_p13 = pnand %p1772_p5, %p1768_p8 }
 0x1a1   : > { %v503_v18 = vpop.xlane.xlu1 %502 }
 0x1a2   : > { %v569_v19 = vmul.f32 %v568_v17, %v503_v18 }
 0x1a4   : > { %v570_v20 = vsub.f32 1.0, %v569_v19 }
 0x1a6   : > { %572 = vst.msk [vmem:[%s488_s27] sm:$0xf] %vm571_vm10, %v570_v20 }
 0x1b8   : > { %v995_v22 = vpop.f32.mrf.mxu0 }
 0x1b9   : > { %v1015_v23 = vpop.f32.mrf.mxu1  ;;  %v955_v24 = vpop.f32.mrf.mxu2 }
 0x1ba   : > { %v1016_v25 = vadd.f32 %v1015_v23, %v995_v22  ;;  %v975_v27 = vpop.f32.mrf.mxu3 }
 0x1bb   : > { %v976_v28 = vadd.f32 %v975_v27, %v955_v24 }
 0x1bc   : > { %v1020_v29 = vrot.slane %v1016_v25, 4 }
 0x1be   : > { %v1021_v30 = vsel %vm498_vm0, %v976_v28, %v1020_v29 }
 0x1bf   : > { %1023 = vst [vmem:[%s477_s20] sm:$0xff] %v1021_v30 }
 0x1c0   : > { %1776 = shalt.err (!%p1773_p13)
}
 0x1c1   : > { %1490 = dma.vmem_to_hbm [thread:$0]  (%p1996_p4), %s1182_s17, 128, %s1184_s29, %s2679_s15   ;;  %v1086_v1 = vpop.f32.mrf.mxu0 }
 0x1c2   : > { %v1106_v4 = vpop.f32.mrf.mxu1  ;;  %s484_s23 = scalar_lea.vmem [#allocation14], %s2052_s11  ;;  %s1198_s28 = sshll.u32 %s1194_s12, 4  ;;  %s1199_s28 = int_to_ptr.hbm [resolvable:$true] %s1198_s28 }
 0x1c3   : > { %v1107_v31 = vadd.f32 %v1106_v4, %v1086_v1  ;;  %v1046_v32 = vpop.f32.mrf.mxu2  ;;  %s1196_s22 = sshll.u32 %s484_s23, 4  ;;  %s1135_s24 = scalar_lea.sflag [#allocation15], %s2049_s13  ;;  %s1197_s22 = int_to_ptr.vmem [resolvable:$true] %s1196_s22 }
 0x1c4   : > { %v1066_v33 = vpop.f32.mrf.mxu3  ;;  %s1791_s20 = sshra.s32 %s1199_s28, 4  ;;  %s1797_s29 = scalar_lea.hbm %s3026_s4, 16  ;;  %s1792_s20 = int_to_ptr.hbm [resolvable:$true] %s1791_s20 }
 0x1c5   : > { %v1111_v34 = vrot.slane %v1107_v31, 4  ;;  %v1067_v35 = vadd.f32 %v1066_v33, %v1046_v32  ;;  %s1793_s15 = scalar_lea.hbm %s1792_s20, 8  ;;  %p1798_p3 = scmp.lt.s32.totalorder %s1792_s20, %s3026_s4 }
 0x1c6   : > { %p1794_p0 = scmp.ne.s32.totalorder %s1792_s20, %s1793_s15  ;;  %p1799_p12 = scmp.lt.s32.totalorder %s1797_s29, %s1793_s15 }
 0x1c7   : > { %v1112_v38 = vsel %vm498_vm0, %v1067_v35, %v1111_v34 }
 0x1c8   : > { %1114 = vst [vmem:[%s484_s23] sm:$0xff] %v1112_v38  ;;  %p1795_p2 = pnand %p1794_p0, %p1996_p4  ;;  %p1800_p7 = por %p1799_p12, %p1798_p3 }
 0x1ca   : > { %p1796_p1 = pneg %p1795_p2 }
 0x1cc   : > { %p1801_p9 = pnand %p1800_p7, %p1796_p1 }
 0x1ce   : > { %1804 = shalt.err (!%p1801_p9)
}
 0x1cf   : > { %1491 = dma.vmem_to_hbm [thread:$0]  (%p1996_p4), %s1197_s22, 128, %s1199_s28, %s1135_s24  }
 0x1d0 PF: > { %s3027_s13 = sld [smem:[#allocation23_spill]] }
 0x1d1   : > { %s3029_s10 = sld [smem:[#allocation25_spill]] }
 0x1d6   : > { %s1217_s16 = sand.u32 1, %s3027_s13  }
 0x1d7   : > { %p3030_p8 = scmp.ge.s32.totalorder %s3029_s10, 2  ;;  %s1218_s21 = scalar_lea.sflag [#allocation4], %s1217_s16 }
 0x1d9   : > { %p1511_p10 = pnand %p3030_p8, %p2000_p6 }
 0x1db   : > { %p1512_p11 = pneg %p1511_p10 }
 0x1dd   : > { %1838 = dma.done.wait (%p1512_p11), %s1218_s21, 128  }
 0x1de   : > { %1840 = vsyncadd (%p1512_p11), %s1218_s21, 4294967168  ;;  %s3031_s5 = sadd.s32 4294967294, %s3029_s10  }
 0x1df   : > { %s1227_s19 = sand.u32 1, %s3031_s5  }
 0x1e0   : > { %s1228_s26 = scalar_lea.sflag [#allocation12], %s1227_s19 }
 0x1e1   : > { %1842 = dma.done.wait (%p1512_p11), %s1228_s26, 256  }
 0x1e2   : > { %1844 = vsyncadd (%p1512_p11), %s1228_s26, 4294967040  ;;  %s1248_s25 = scalar_lea.sflag [#allocation15], %s1217_s16 }
 0x1e3   : > { %1846 = dma.done.wait (%p1512_p11), %s1248_s25, 128  }
 0x1e4   : > { %1848 = vsyncadd (%p1512_p11), %s1248_s25, 4294967168  ;;  %s3032_s16 = sld [smem:[#allocation26_spill]]  ;;  %s3035_s13 = smov %s1855_s14 }
 0x1e5   : > { %s3033_s27 = sld [smem:[#allocation24_spill]] }
 0x1e6   : > { %s3034_s15 = sld [smem:[#allocation27_spill]] }
 0x1ea   : > { %p34_p4 = scmp.ge.s32.totalorder %s3032_s16, 4  }
 0x1eb   : > { %s3036_s14 = smov %s3033_s27 }
 0x1ec   :  { %36 = sbr.rel (!%p34_p4) target bundleno = 16 (0x10), region = 171 }
 0x1f1   :  { %1254 = vsyncpa [#allocation3], 1 }
 0x1f2   :  { %1256 = vsyncpa [#allocation3 + $0x1], 1 }
 0x1f3   :  { %1257 = vsyncpa [#allocation6], 1 }
 0x1f4   :  { %1259 = vsyncpa [#allocation6 + $0x1], 1 }
 0x1f5   :  { %1260 = vsyncpa [#allocation9], 1 }
 0x1f6   :  { %1261 = vsyncpa [#allocation4], 1 }
 0x1f7   :  { %1263 = vsyncpa [#allocation4 + $0x1], 1 }
 0x1f8   :  { %1264 = vsyncpa [#allocation12], 1 }
 0x1f9   :  { %1266 = vsyncpa [#allocation12 + $0x1], 1 }
 0x1fa   :  { %1267 = vsyncpa [#allocation15], 1 }
 0x1fb   :  { %1269 = vsyncpa [#allocation15 + $0x1], 1 }

</bundles_post_ra>
